<compile_context>
chip_gen: v5e
topology: v5e:2x2
jax: 0.10.0
libtpu: 0.0.40
codegen_flags: <defaults>
</compile_context>

<pallas_src>
import functools

import jax
import jax.numpy as jnp
from jax.experimental import pallas as pl
from jax.experimental.pallas import tpu as pltpu

ROBERTA_HIDDEN = 768   # fixed by the module
CHAR_HIDDEN = 64       # config.char_hidden_size (synthetic)
OUT_FEATURES = 768     # fixed by the module


def _round_up(x, m):
    return ((x + m - 1) // m) * m


def _choose_tm(m, tm_max):
    """Row-tile size.

    - Single full-extent block for small M (always layout-legal).
    - For larger M, tiles of up to tm_max rows, but at least 4 grid steps
      (>= 2 per v7x TensorCore under dimension_semantics=("parallel",)) when
      that keeps tiles >= 256 rows.
    - When the tile does not cover all rows (partial last block), the tile
      height is forced to a multiple of 8 (f32 sublane granularity).
    """
    tm_eff = min(m, tm_max)
    if m > 512:
        tm_eff = min(tm_eff, max(256, _round_up(-(-m // 4), 8)))
    if tm_eff < m:
        tm_eff = max(8, (tm_eff // 8) * 8)
    return tm_eff


def _combine_kernel(rob_ref, char_ref, wr_ref, wc_ref, b_ref, out_ref):
    # Fused "concat along feature dim + Linear":
    #   cat([rob, char], -1) @ W.T + b  ==  rob @ Wr + char @ Wc + b
    # Activations are cast to the weight dtype *in VMEM* (no extra HBM pass in
    # the bf16 path); MXU accumulates in f32; bias add in f32.
    cdt = wr_ref.dtype
    acc = jnp.dot(rob_ref[...].astype(cdt), wr_ref[...],
                  preferred_element_type=jnp.float32)
    acc = acc + jnp.dot(char_ref[...].astype(cdt), wc_ref[...],
                        preferred_element_type=jnp.float32)
    out_ref[...] = (acc + b_ref[...]).astype(out_ref.dtype)


def prepare_combine_params(weight, bias, hr=ROBERTA_HIDDEN, compute_dtype=None):
    """One-time parameter prep (hoisted out of the forward path).

    weight: [768, 768 + Hc] (PyTorch nn.Linear layout), bias: [768].
    Returns Wr:[768, 768], Wc:[Hc, 768] in `compute_dtype` and f32 bias [1,768].
    """
    if compute_dtype is None:
        compute_dtype = weight.dtype
    wr = jnp.asarray(weight[:, :hr].T, dtype=compute_dtype)       # [Hr, out]
    wc = jnp.asarray(weight[:, hr:].T, dtype=compute_dtype)       # [Hc, out]
    b2d = jnp.asarray(bias, dtype=jnp.float32).reshape(1, -1)     # f32 bias add
    return wr, wc, b2d


@functools.partial(jax.jit, static_argnames=("tm", "out_dtype"))
def combine_char_roberta_forward(roberta_emb, char_emb, wr, wc, b2d,
                                 tm=1024, out_dtype=None):
    """roberta_emb: [B, S, 768], char_emb: [B, S, Hc],
       wr/wc/b2d: outputs of prepare_combine_params (weight-stationary).
       out_dtype: optional narrower output dtype (e.g. jnp.bfloat16)."""
    B, S, Hr = roberta_emb.shape
    Hc = char_emb.shape[-1]
    out_f = wr.shape[-1]
    M = B * S
    if out_dtype is None:
        out_dtype = roberta_emb.dtype

    # Free reshapes only — no pad, no dtype cast (both would add HBM passes).
    rob2d = roberta_emb.reshape(M, Hr)
    char2d = char_emb.reshape(M, Hc)

    tm_eff = _choose_tm(M, tm)
    grid = (pl.cdiv(M, tm_eff),)   # partial last block masked by Pallas

    act_bytes = rob2d.dtype.itemsize
    w_bytes = wr.dtype.itemsize
    out_bytes = jax.dtypes.canonicalize_dtype(out_dtype).itemsize
    cost = pl.CostEstimate(
        flops=2 * M * (Hr + Hc) * out_f,
        transcendentals=0,
        bytes_accessed=(M * (Hr + Hc) * act_bytes          # activation reads
                        + (Hr + Hc) * out_f * w_bytes      # weights (read once)
                        + out_f * 4                        # bias
                        + M * out_f * out_bytes),          # output write
    )

    out2d = pl.pallas_call(
        _combine_kernel,
        out_shape=jax.ShapeDtypeStruct((M, out_f), out_dtype),
        grid_spec=pltpu.PrefetchScalarGridSpec(
            num_scalar_prefetch=0,
            grid=grid,
            in_specs=[
                pl.BlockSpec((tm_eff, Hr), lambda i: (i, 0)),
                pl.BlockSpec((tm_eff, Hc), lambda i: (i, 0)),
                pl.BlockSpec((Hr, out_f), lambda i: (0, 0)),   # weight-stationary
                pl.BlockSpec((Hc, out_f), lambda i: (0, 0)),   # weight-stationary
                pl.BlockSpec((1, out_f), lambda i: (0, 0)),
            ],
            out_specs=pl.BlockSpec((tm_eff, out_f), lambda i: (i, 0)),
        ),
        compiler_params=pltpu.CompilerParams(
            dimension_semantics=("parallel",),
            vmem_limit_bytes=48 * 1024 * 1024,
        ),
        cost_estimate=cost,
    )(rob2d, char2d, wr, wc, b2d)

    return out2d.reshape(B, S, out_f)


if __name__ == "__main__":
    key = jax.random.PRNGKey(0)
    k_rob, k_char, k_w, k_b = jax.random.split(key, 4)

    in_features = ROBERTA_HIDDEN + CHAR_HIDDEN
    # Deterministic nn.Linear init (PyTorch default: U(-1/sqrt(in), 1/sqrt(in)))
    bound = 1.0 / (in_features ** 0.5)
    weight = jax.random.uniform(k_w, (OUT_FEATURES, in_features),
                                jnp.float32, -bound, bound)
    bias = jax.random.uniform(k_b, (OUT_FEATURES,), jnp.float32, -bound, bound)

    # One-time (hoisted) weight split + transpose; f32 and bf16 variants.
    wr32, wc32, b2d = prepare_combine_params(weight, bias)
    wr16, wc16, _ = prepare_combine_params(weight, bias,
                                           compute_dtype=jnp.bfloat16)

    def ref_forward(rob, char):
        # Reference: explicit concat + linear (semantics of the PyTorch forward).
        return jnp.concatenate([rob, char], axis=2) @ weight.T + bias

    # Case 1: f32 path, small shapes (single full-extent block).
    B, S = 2, 8
    roberta_emb = jax.random.normal(k_rob, (B, S, ROBERTA_HIDDEN), jnp.float32)
    char_emb = jax.random.normal(k_char, (B, S, CHAR_HIDDEN), jnp.float32)
    # roberta_input_len passthrough (module returns it unchanged)
    input_len = jnp.full((B,), S, dtype=jnp.int32)

    final_embedding = combine_char_roberta_forward(
        roberta_emb, char_emb, wr32, wc32, b2d)
    final_embedding = jax.block_until_ready(final_embedding)
    assert final_embedding.shape == (B, S, OUT_FEATURES)
    assert jnp.allclose(final_embedding, ref_forward(roberta_emb, char_emb),
                        atol=1e-4, rtol=1e-4)
    assert input_len.shape == (B,)

    # Case 2: B*S not a multiple of the tile -> masked partial last block
    # (no jnp.pad); small tm forces a multi-step grid.
    B2, S2 = 3, 7
    rob2 = jax.random.normal(jax.random.PRNGKey(1),
                             (B2, S2, ROBERTA_HIDDEN), jnp.float32)
    char2 = jax.random.normal(jax.random.PRNGKey(2),
                              (B2, S2, CHAR_HIDDEN), jnp.float32)
    out2 = jax.block_until_ready(
        combine_char_roberta_forward(rob2, char2, wr32, wc32, b2d, tm=8))
    assert out2.shape == (B2, S2, OUT_FEATURES)
    assert jnp.allclose(out2, ref_forward(rob2, char2), atol=1e-4, rtol=1e-4)

    # Case 3: bf16 weights; activations cast in-kernel (no extra HBM pass),
    # f32 accumulation and f32 output; looser tolerance vs the f32 reference.
    out3 = jax.block_until_ready(
        combine_char_roberta_forward(roberta_emb, char_emb, wr16, wc16, b2d))
    assert jnp.allclose(out3, ref_forward(roberta_emb, char_emb),
                        atol=5e-2, rtol=5e-2)

    # Case 4: bf16 weights + bf16 output (halves the largest HBM stream).
    out4 = jax.block_until_ready(
        combine_char_roberta_forward(roberta_emb, char_emb, wr16, wc16, b2d,
                                     out_dtype=jnp.bfloat16))
    assert out4.dtype == jnp.bfloat16
    assert jnp.allclose(out4.astype(jnp.float32),
                        ref_forward(roberta_emb, char_emb),
                        atol=1e-1, rtol=1e-1)

    print("KERNEL_OK")
</pallas_src>

<mosaic_0001>
module attributes {stable_mosaic.version = 11 : i64} {
  func.func @_combine_kernel(%arg0: i32, %arg1: memref<16x768xf32, #tpu.memory_space<vmem>>, %arg2: memref<16x64xf32, #tpu.memory_space<vmem>>, %arg3: memref<768x768xf32, #tpu.memory_space<vmem>>, %arg4: memref<64x768xf32, #tpu.memory_space<vmem>>, %arg5: memref<1x768xf32, #tpu.memory_space<vmem>>, %arg6: memref<16x768xf32, #tpu.memory_space<vmem>>) attributes {dimension_semantics = [#tpu.dimension_semantics<parallel>], iteration_bounds = array<i64: 1>, scalar_prefetch = 0 : i64, scratch_operands = 0 : i64, tpu.core_type = #tpu.core_type<tc>, window_params = [{transform_indices = @transform_0, window_bounds = array<i64: 16, 768>}, {transform_indices = @transform_1, window_bounds = array<i64: 16, 64>}, {pipeline_mode = #tpu.pipeline_mode<synchronous>, transform_indices = @transform_2, window_bounds = array<i64: 768, 768>}, {pipeline_mode = #tpu.pipeline_mode<synchronous>, transform_indices = @transform_3, window_bounds = array<i64: 64, 768>}, {pipeline_mode = #tpu.pipeline_mode<synchronous>, transform_indices = @transform_4, window_bounds = array<i64: 1, 768>}, {transform_indices = @transform_5, window_bounds = array<i64: 16, 768>}]} {
    %c0 = arith.constant 0 : index
    %c0_0 = arith.constant 0 : index
    %0 = vector.load %arg1[%c0, %c0_0] : memref<16x768xf32, #tpu.memory_space<vmem>>, vector<16x768xf32>
    %c0_1 = arith.constant 0 : index
    %c0_2 = arith.constant 0 : index
    %1 = vector.load %arg3[%c0_1, %c0_2] : memref<768x768xf32, #tpu.memory_space<vmem>>, vector<768x768xf32>
    %cst = arith.constant dense<0.000000e+00> : vector<16x768xf32>
    %2 = tpu.matmul %0, %1, %cst {dimension_numbers = #tpu.dot_dimension_numbers<[1], [0], [0], [1], [0, 0, 1, 1], [], []>} : vector<16x768xf32>, vector<768x768xf32>, vector<16x768xf32> -> vector<16x768xf32>
    %c0_3 = arith.constant 0 : index
    %c0_4 = arith.constant 0 : index
    %3 = vector.load %arg2[%c0_3, %c0_4] : memref<16x64xf32, #tpu.memory_space<vmem>>, vector<16x64xf32>
    %c0_5 = arith.constant 0 : index
    %c0_6 = arith.constant 0 : index
    %4 = vector.load %arg4[%c0_5, %c0_6] : memref<64x768xf32, #tpu.memory_space<vmem>>, vector<64x768xf32>
    %cst_7 = arith.constant dense<0.000000e+00> : vector<16x768xf32>
    %5 = tpu.matmul %3, %4, %cst_7 {dimension_numbers = #tpu.dot_dimension_numbers<[1], [0], [0], [1], [0, 0, 1, 1], [], []>} : vector<16x64xf32>, vector<64x768xf32>, vector<16x768xf32> -> vector<16x768xf32>
    %6 = arith.addf %2, %5 : vector<16x768xf32>
    %c0_8 = arith.constant 0 : index
    %c0_9 = arith.constant 0 : index
    %7 = vector.load %arg5[%c0_8, %c0_9] : memref<1x768xf32, #tpu.memory_space<vmem>>, vector<1x768xf32>
    %8 = vector.broadcast %7 : vector<1x768xf32> to vector<16x768xf32>
    %9 = arith.addf %6, %8 : vector<16x768xf32>
    %c0_10 = arith.constant 0 : index
    %c0_11 = arith.constant 0 : index
    %10 = vector.load %arg6[%c0_10, %c0_11] : memref<16x768xf32, #tpu.memory_space<vmem>>, vector<16x768xf32>
    tpu.vector_store %arg6[%c0_10, %c0_11], %9 {strides = array<i32>} : memref<16x768xf32, #tpu.memory_space<vmem>>, vector<16x768xf32>,
    return
  }
  func.func @transform_0(%arg0: i32) -> (i32, i32) {
    %c0_i32 = arith.constant 0 : i32
    %c0_i32_0 = arith.constant 0 : i32
    return %arg0, %c0_i32 : i32, i32
  }
  func.func @transform_1(%arg0: i32) -> (i32, i32) {
    %c0_i32 = arith.constant 0 : i32
    %c0_i32_0 = arith.constant 0 : i32
    return %arg0, %c0_i32 : i32, i32
  }
  func.func @transform_2(%arg0: i32) -> (i32, i32) {
    %c0_i32 = arith.constant 0 : i32
    %c0_i32_0 = arith.constant 0 : i32
    %c0_i32_1 = arith.constant 0 : i32
    return %c0_i32, %c0_i32_0 : i32, i32
  }
  func.func @transform_3(%arg0: i32) -> (i32, i32) {
    %c0_i32 = arith.constant 0 : i32
    %c0_i32_0 = arith.constant 0 : i32
    %c0_i32_1 = arith.constant 0 : i32
    return %c0_i32, %c0_i32_0 : i32, i32
  }
  func.func @transform_4(%arg0: i32) -> (i32, i32) {
    %c0_i32 = arith.constant 0 : i32
    %c0_i32_0 = arith.constant 0 : i32
    %c0_i32_1 = arith.constant 0 : i32
    return %c0_i32, %c0_i32_0 : i32, i32
  }
  func.func @transform_5(%arg0: i32) -> (i32, i32) {
    %c0_i32 = arith.constant 0 : i32
    %c0_i32_0 = arith.constant 0 : i32
    return %arg0, %c0_i32 : i32, i32
  }
}

</mosaic_0001>

<bundles_post_ra>
// kernel: combine_char_roberta_forward.1
= control target key start
LH: loop header
LB: loop body
LE: loop exit
PB: predicated region body
PF: predicated region fallthrough
CT: control target
= control target key end

     0   :  { %10 = vsyncpa [#allocation3], 0  ;;  %s2226_s0 = inlined_call_operand.hbm [shape: f32[16,768], index: 0, kind: input, shape index: {}]   ;;  %s2227_s1 = inlined_call_operand.hbm [shape: f32[16,64], index: 1, kind: input, shape index: {}]   ;;  %s2228_s2 = inlined_call_operand.hbm [shape: f32[768,768], index: 2, kind: input, shape index: {}]   ;;  %s2229_s3 = inlined_call_operand.hbm [shape: f32[64,768], index: 3, kind: input, shape index: {}]   ;;  %s2230_s4 = inlined_call_operand.hbm [shape: f32[1,768], index: 4, kind: input, shape index: {}]   ;;  %s2231_s5 = inlined_call_operand.hbm [shape: f32[16,768], index: 5, kind: output, shape index: {}]  }
   0x1   :  { %11 = vsyncpa [#allocation6], 0 }
   0x2   :  { %12 = vsyncpa [#allocation9], 0  ;;  %s31_s20 = sshll.u32 %s2227_s1, 4  ;;  %s32_s20 = int_to_ptr.hbm [resolvable:$true] %s31_s20 }
   0x3   :  { %13 = vsyncpa [#allocation4], 0  ;;  %s1954_s21 = smov [#allocation5]   ;;  %s1955_s23 = smov 128  }
   0x4   :  { %s33_s22 = sshll.u32 %s1954_s21, 4  ;;  %s1956_s24 = smov 8   ;;  %s34_s22 = int_to_ptr.vmem [resolvable:$true] %s33_s22 }
   0x5   :  { %39 = dma.hbm_to_vmem [thread:$0]  %s32_s20, 256, %s34_s22, [#allocation6], %s1955_s23, %s1955_s23, %s1956_s24  }
   0x6   :  { %s57_s27 = sshll.u32 %s2229_s3, 4  ;;  %s1957_s28 = smov [#allocation8]   ;;  %s58_s27 = int_to_ptr.hbm [resolvable:$true] %s57_s27 }
   0x7   :  { %s59_s29 = sshll.u32 %s1957_s28, 4  ;;  %s18_s7 = sshll.u32 %s2226_s0, 4  ;;  %s60_s29 = int_to_ptr.vmem [resolvable:$true] %s59_s29  ;;  %s19_s7 = int_to_ptr.hbm [resolvable:$true] %s18_s7 }
   0x8   :  { %s1958_s1 = smov 768   ;;  %s1959_s8 = smov 48  }
   0x9   :  { %65 = dma.hbm_to_vmem [thread:$0]  %s58_s27, 6144, %s60_s29, [#allocation9], %s1958_s1, %s1958_s1, %s1959_s8  }
   0xa   :  { %s44_s11 = sshll.u32 %s2228_s2, 4  ;;  %s1960_s3 = smov [#allocation2]   ;;  %s45_s11 = int_to_ptr.hbm [resolvable:$true] %s44_s11 }
   0xb   :  { %s20_s12 = sshll.u32 %s1960_s3, 4  ;;  %s1961_s0 = smov [#allocation7]   ;;  %s21_s12 = int_to_ptr.vmem [resolvable:$true] %s20_s12 }
   0xc   :  { %26 = dma.hbm_to_vmem [thread:$0]  %s19_s7, 1536, %s21_s12, [#allocation3], %s1958_s1, %s1958_s1, %s1959_s8  }
   0xd   :  { %s46_s13 = sshll.u32 %s1961_s0, 4  ;;  %s71_s16 = sshll.u32 %s2230_s4, 4  ;;  %s47_s13 = int_to_ptr.vmem [resolvable:$true] %s46_s13  ;;  %s72_s16 = int_to_ptr.hbm [resolvable:$true] %s71_s16 }
   0xe   :  { %52 = dma.hbm_to_vmem [thread:$0]  %s45_s11, 73728, %s47_s13, [#allocation6], %s1958_s1, %s1958_s1, %s1959_s8  }
   0xf   :  { %s1962_s2 = smov [#allocation10]  }
  0x10   :  { %s73_s17 = sshll.u32 %s1962_s2, 4  ;;  %s74_s17 = int_to_ptr.vmem [resolvable:$true] %s73_s17 }
  0x11   :  { %76 = dma.hbm_to_vmem [thread:$0]  %s72_s16, 96, %s74_s17, [#allocation9]  }
  0x12   :  { %1946 = dma.done.wait [#allocation3], 1536  }
  0x13   :  { %1947 = vsyncadd [#allocation3], 4294965760 }
  0x14   :  { %1948 = dma.done.wait [#allocation6], 73984  }
  0x15   :  { %1949 = vsyncadd [#allocation6], 4294893312 }
  0x16   :  { %1950 = dma.done.wait [#allocation9], 6240  }
  0x17   :  { %1951 = vsyncadd [#allocation9], 4294961056  ;;  %v729_v0 = vld [vmem:[#allocation8 + $0x150] sm:$0xff]  ;;  %v731_v1 = vld [vmem:[#allocation8 + $0x160] sm:$0xff]  ;;  %vm735_vm0 = vcmask 523264   ;;  %s1963_s4 = smov [#allocation11]  }
  0x18   :  { %v723_v2 = vld [vmem:[#allocation8 + $0x120] sm:$0xff]  ;;  %750 = vmatpush.msra.mxu0 %v729_v0  ;;  %796 = vmatpush.msra.mxu2 %v731_v1  ;;  %v730_v3 = vld [vmem:[#allocation8 + $0x158] sm:$0xff]  ;;  %v725_v4 = vld [vmem:[#allocation8 + $0x130] sm:$0xff]  ;;  %s1750_s18 = sshll.u32 %s1963_s4, 4  ;;  %s1752_s21 = sshll.u32 %s2231_s5, 4  ;;  %s1751_s18 = int_to_ptr.vmem [resolvable:$true] %s1750_s18  ;;  %s1753_s21 = int_to_ptr.hbm [resolvable:$true] %s1752_s21 }
  0x19   :  { %v732_v5 = vld [vmem:[#allocation8 + $0x168] sm:$0xff]  ;;  %773 = vmatpush.msra.mxu1 %v730_v3  ;;  %v717_v6 = vld [vmem:[#allocation8 + $0xf0] sm:$0xff]  ;;  %v719_v8 = vld [vmem:[#allocation8 + $0x100] sm:$0xff] }
  0x1a   :  { %819 = vmatpush.msra.mxu3 %v732_v5  ;;  %v724_v7 = vld [vmem:[#allocation8 + $0x128] sm:$0xff]  ;;  %751 = vmatpush.msra.mxu0 %v723_v2  ;;  %v726_v9 = vld [vmem:[#allocation8 + $0x138] sm:$0xff]  ;;  %v711_v11 = vld [vmem:[#allocation8 + $0xc0] sm:$0xff] }
  0x1b   :  { %797 = vmatpush.msra.mxu2 %v725_v4  ;;  %v718_v10 = vld [vmem:[#allocation8 + $0xf8] sm:$0xff]  ;;  %774 = vmatpush.msra.mxu1 %v724_v7  ;;  %v713_v12 = vld [vmem:[#allocation8 + $0xd0] sm:$0xff]  ;;  %v720_v13 = vld [vmem:[#allocation8 + $0x108] sm:$0xff] }
  0x1c   :  { %820 = vmatpush.msra.mxu3 %v726_v9  ;;  %752 = vmatpush.msra.mxu0 %v717_v6  ;;  %v712_v14 = vld [vmem:[#allocation8 + $0xc8] sm:$0xff]  ;;  %v714_v15 = vld [vmem:[#allocation8 + $0xd8] sm:$0xff]  ;;  %v705_v16 = vld [vmem:[#allocation8 + $0x90] sm:$0xff] }
  0x1d   :  { %798 = vmatpush.msra.mxu2 %v719_v8  ;;  %775 = vmatpush.msra.mxu1 %v718_v10  ;;  %v707_v17 = vld [vmem:[#allocation8 + $0xa0] sm:$0xff]  ;;  %v706_v18 = vld [vmem:[#allocation8 + $0x98] sm:$0xff]  ;;  %v708_v19 = vld [vmem:[#allocation8 + $0xa8] sm:$0xff] }
  0x1e   :  { %821 = vmatpush.msra.mxu3 %v720_v13  ;;  %753 = vmatpush.msra.mxu0 %v711_v11  ;;  %v699_v20 = vld [vmem:[#allocation8 + $0x60] sm:$0xff]  ;;  %v701_v21 = vld [vmem:[#allocation8 + $0x70] sm:$0xff]  ;;  %v700_v22 = vld [vmem:[#allocation8 + $0x68] sm:$0xff] }
  0x1f   :  { %799 = vmatpush.msra.mxu2 %v713_v12  ;;  %776 = vmatpush.msra.mxu1 %v712_v14  ;;  %v702_v23 = vld [vmem:[#allocation8 + $0x78] sm:$0xff]  ;;  %v693_v24 = vld [vmem:[#allocation8 + $0x30] sm:$0xff]  ;;  %v695_v25 = vld [vmem:[#allocation8 + $0x40] sm:$0xff] }
  0x20   :  { %822 = vmatpush.msra.mxu3 %v714_v15  ;;  %754 = vmatpush.msra.mxu0 %v705_v16  ;;  %v694_v26 = vld [vmem:[#allocation8 + $0x38] sm:$0xff]  ;;  %v696_v27 = vld [vmem:[#allocation8 + $0x48] sm:$0xff]  ;;  %v687_v28 = vld [vmem:[#allocation8] sm:$0xff] }
  0x21   :  { %800 = vmatpush.msra.mxu2 %v707_v17  ;;  %777 = vmatpush.msra.mxu1 %v706_v18  ;;  %v689_v29 = vld [vmem:[#allocation8 + $0x10] sm:$0xff]  ;;  %v688_v32 = vld [vmem:[#allocation8 + $0x8] sm:$0xff]  ;;  %v690_v33 = vld [vmem:[#allocation8 + $0x18] sm:$0xff] }
  0x22   :  { %823 = vmatpush.msra.mxu3 %v708_v19  ;;  %755 = vmatpush.msra.mxu0 %v699_v20  ;;  %v733_v30 = vld [vmem:[#allocation8 + $0x170] sm:$0xff]  ;;  %v727_v34 = vld [vmem:[#allocation8 + $0x140] sm:$0xff]  ;;  %v734_v35 = vld [vmem:[#allocation8 + $0x178] sm:$0xff] }
  0x23   :  { %801 = vmatpush.msra.mxu2 %v701_v21  ;;  %778 = vmatpush.msra.mxu1 %v700_v22  ;;  %v199_v31 = vld [vmem:[#allocation7 + $0x2d0] sm:$0xff]  ;;  %v193_v36 = vld [vmem:[#allocation7 + $0x2a0] sm:$0xff]  ;;  %v728_v39 = vld [vmem:[#allocation8 + $0x148] sm:$0xff] }
  0x24   :  { %824 = vmatpush.msra.mxu3 %v702_v23  ;;  %756 = vmatpush.msra.mxu0 %v693_v24  ;;  %v295_v37 = vld [vmem:[#allocation7 + $0x5d0] sm:$0xff]  ;;  %v289_v41 = vld [vmem:[#allocation7 + $0x5a0] sm:$0xff]  ;;  %v722_v43 = vld [vmem:[#allocation8 + $0x118] sm:$0xff] }
  0x25   :  { %802 = vmatpush.msra.mxu2 %v695_v25  ;;  %779 = vmatpush.msra.mxu1 %v694_v26  ;;  %v721_v38 = vld [vmem:[#allocation8 + $0x110] sm:$0xff]  ;;  %v715_v42 = vld [vmem:[#allocation8 + $0xe0] sm:$0xff]  ;;  %v716_v47 = vld [vmem:[#allocation8 + $0xe8] sm:$0xff] }
  0x26   :  { %825 = vmatpush.msra.mxu3 %v696_v27  ;;  %757 = vmatpush.msra.mxu0 %v687_v28  ;;  %v187_v40 = vld [vmem:[#allocation7 + $0x270] sm:$0xff]  ;;  %v181_v44 = vld [vmem:[#allocation7 + $0x240] sm:$0xff]  ;;  %v710_v51 = vld [vmem:[#allocation8 + $0xb8] sm:$0xff] }
  0x27   :  { %803 = vmatpush.msra.mxu2 %v689_v29  ;;  %780 = vmatpush.msra.mxu1 %v688_v32  ;;  %v283_v45 = vld [vmem:[#allocation7 + $0x570] sm:$0xff]  ;;  %v277_v49 = vld [vmem:[#allocation7 + $0x540] sm:$0xff]  ;;  %v704_v55 = vld [vmem:[#allocation8 + $0x88] sm:$0xff] }
  0x28   :  { %842 = vmatpush.msrb.mxu0 %v733_v30  ;;  %826 = vmatpush.msra.mxu3 %v690_v33  ;;  %v709_v46 = vld [vmem:[#allocation8 + $0xb0] sm:$0xff]  ;;  %v703_v50 = vld [vmem:[#allocation8 + $0x80] sm:$0xff]  ;;  %v698_v59 = vld [vmem:[#allocation8 + $0x58] sm:$0xff] }
  0x29   :  { %880 = vmatpush.msrb.mxu2 %v199_v31  ;;  %865 = vmatpush.msrb.mxu1 %v734_v35  ;;  %v175_v48 = vld [vmem:[#allocation7 + $0x210] sm:$0xff]  ;;  %v169_v52 = vld [vmem:[#allocation7 + $0x1e0] sm:$0xff]  ;;  %v692_v0 = vld [vmem:[#allocation8 + $0x28] sm:$0xff] }
  0x2a   :  { %843 = vmatpush.msrb.mxu0 %v727_v34  ;;  %903 = vmatpush.msrb.mxu3 %v295_v37  ;;  %v271_v53 = vld [vmem:[#allocation7 + $0x510] sm:$0xff]  ;;  %v265_v57 = vld [vmem:[#allocation7 + $0x4e0] sm:$0xff]  ;;  %v2028_v13 = vld [vmem:[#allocation5 + $0x8] sm:$0xff] }
  0x2b   :  { %881 = vmatpush.msrb.mxu2 %v193_v36  ;;  %866 = vmatpush.msrb.mxu1 %v728_v39  ;;  %v697_v54 = vld [vmem:[#allocation8 + $0x50] sm:$0xff]  ;;  %v691_v60 = vld [vmem:[#allocation8 + $0x20] sm:$0xff] }
  0x2c   :  { %844 = vmatpush.msrb.mxu0 %v721_v38  ;;  %904 = vmatpush.msrb.mxu3 %v289_v41  ;;  %v163_v56 = vld [vmem:[#allocation7 + $0x1b0] sm:$0xff]  ;;  %v157_v61 = vld [vmem:[#allocation7 + $0x180] sm:$0xff]  ;;  %v2043_v38 = vld [vmem:[#allocation2 + $0x8] sm:$0xff] }
  0x2d   :  { %882 = vmatpush.msrb.mxu2 %v187_v40  ;;  %867 = vmatpush.msrb.mxu1 %v722_v43  ;;  %v2018_v58 = vld [vmem:[#allocation5] sm:$0xff]  ;;  %v253_v2 = vld [vmem:[#allocation7 + $0x480] sm:$0xff] }
  0x2e   :  { %845 = vmatpush.msrb.mxu0 %v715_v42  ;;  %905 = vmatpush.msrb.mxu3 %v283_v45  ;;  %v259_v62 = vld [vmem:[#allocation7 + $0x4b0] sm:$0xff]  ;;  %v385_v3 = vld [vmem:[#allocation7 + $0x8a0] sm:$0xff] }
  0x2f   :  { %883 = vmatpush.msrb.mxu2 %v181_v44  ;;  %868 = vmatpush.msrb.mxu1 %v716_v47  ;;  %v391_v63 = vld [vmem:[#allocation7 + $0x8d0] sm:$0xff]  ;;  %v145_v5 = vld [vmem:[#allocation7 + $0x120] sm:$0xff] }
  0x30   :  { %846 = vmatpush.msrb.mxu0 %v709_v46  ;;  %906 = vmatpush.msrb.mxu3 %v277_v49  ;;  %v151_v1 = vld [vmem:[#allocation7 + $0x150] sm:$0xff]  ;;  %v481_v8 = vld [vmem:[#allocation7 + $0xba0] sm:$0xff] }
  0x31   :  { %884 = vmatpush.msrb.mxu2 %v175_v48  ;;  %869 = vmatpush.msrb.mxu1 %v710_v51  ;;  %v487_v4 = vld [vmem:[#allocation7 + $0xbd0] sm:$0xff]  ;;  %v241_v10 = vld [vmem:[#allocation7 + $0x420] sm:$0xff] }
  0x32   :  { %847 = vmatpush.msrb.mxu0 %v703_v50  ;;  %907 = vmatpush.msrb.mxu3 %v271_v53  ;;  %v247_v6 = vld [vmem:[#allocation7 + $0x450] sm:$0xff]  ;;  %v373_v11 = vld [vmem:[#allocation7 + $0x840] sm:$0xff] }
  0x33   :  { %885 = vmatpush.msrb.mxu2 %v169_v52  ;;  %870 = vmatpush.msrb.mxu1 %v704_v55  ;;  %v379_v7 = vld [vmem:[#allocation7 + $0x870] sm:$0xff]  ;;  %v133_v14 = vld [vmem:[#allocation7 + $0xc0] sm:$0xff]  ;;  %v2053_v55 = vld [vmem:[#allocation2 + $0x38] sm:$0xff] }
  0x34   :  { %848 = vmatpush.msrb.mxu0 %v697_v54  ;;  %908 = vmatpush.msrb.mxu3 %v265_v57  ;;  %v139_v9 = vld [vmem:[#allocation7 + $0xf0] sm:$0xff]  ;;  %v469_v17 = vld [vmem:[#allocation7 + $0xb40] sm:$0xff] }
  0x35   :  { %886 = vmatpush.msrb.mxu2 %v163_v56  ;;  %1767 = vmatmul.msk.f32.vlgmr.msra.gmra.mxu0 %vm735_vm0, %v2018_v58  ;;  %v475_v12 = vld [vmem:[#allocation7 + $0xb70] sm:$0xff]  ;;  %v229_v19 = vld [vmem:[#allocation7 + $0x3c0] sm:$0xff] }
  0x36   :  { %871 = vmatpush.msrb.mxu1 %v698_v59  ;;  %849 = vmatpush.msrb.mxu0 %v691_v60  ;;  %v235_v15 = vld [vmem:[#allocation7 + $0x3f0] sm:$0xff]  ;;  %v361_v20 = vld [vmem:[#allocation7 + $0x7e0] sm:$0xff] }
  0x37   :  { %887 = vmatpush.msrb.mxu2 %v157_v61  ;;  %909 = vmatpush.msrb.mxu3 %v259_v62  ;;  %v367_v16 = vld [vmem:[#allocation7 + $0x810] sm:$0xff]  ;;  %v121_v22 = vld [vmem:[#allocation7 + $0x60] sm:$0xff] }
  0x38   :  { %1771 = vmatmul.msk.f32.vlgmr.msra.gmra.mxu2 %vm735_vm0, %v2018_v58  ;;  %926 = vmatpush.msra.mxu0 %v391_v63  ;;  %v127_v18 = vld [vmem:[#allocation7 + $0x90] sm:$0xff]  ;;  %v457_v25 = vld [vmem:[#allocation7 + $0xae0] sm:$0xff] }
  0x39   :  { %1769 = vmatmul.msk.f32.vlgmr.msra.gmra.mxu1 %vm735_vm0, %v2018_v58  ;;  %888 = vmatpush.msrb.mxu2 %v151_v1  ;;  %v463_v21 = vld [vmem:[#allocation7 + $0xb10] sm:$0xff]  ;;  %v217_v27 = vld [vmem:[#allocation7 + $0x360] sm:$0xff] }
  0x3a   :  { %872 = vmatpush.msrb.mxu1 %v692_v0  ;;  %910 = vmatpush.msrb.mxu3 %v253_v2  ;;  %v223_v23 = vld [vmem:[#allocation7 + $0x390] sm:$0xff]  ;;  %v349_v28 = vld [vmem:[#allocation7 + $0x780] sm:$0xff] }
  0x3b   :  { %927 = vmatpush.msra.mxu0 %v385_v3  ;;  %1773 = vmatmul.msk.f32.vlgmr.msra.gmra.mxu3 %vm735_vm0, %v2018_v58  ;;  %v355_v24 = vld [vmem:[#allocation7 + $0x7b0] sm:$0xff]  ;;  %v109_v30 = vld [vmem:[#allocation7] sm:$0xff] }
  0x3c   :  { %949 = vmatpush.msra.mxu1 %v487_v4  ;;  %889 = vmatpush.msrb.mxu2 %v145_v5  ;;  %v115_v26 = vld [vmem:[#allocation7 + $0x30] sm:$0xff]  ;;  %v445_v34 = vld [vmem:[#allocation7 + $0xa80] sm:$0xff] }
  0x3d   :  { %911 = vmatpush.msrb.mxu3 %v247_v6  ;;  %928 = vmatpush.msra.mxu0 %v379_v7  ;;  %v451_v29 = vld [vmem:[#allocation7 + $0xab0] sm:$0xff]  ;;  %v205_v36 = vld [vmem:[#allocation7 + $0x300] sm:$0xff]  ;;  %v200_v6 = vld [vmem:[#allocation7 + $0x2d8] sm:$0xff] }
  0x3e   :  { %950 = vmatpush.msra.mxu1 %v481_v8  ;;  %890 = vmatpush.msrb.mxu2 %v139_v9  ;;  %v211_v31 = vld [vmem:[#allocation7 + $0x330] sm:$0xff]  ;;  %v337_v37 = vld [vmem:[#allocation7 + $0x720] sm:$0xff]  ;;  %v2060_v9 = vld [vmem:[#allocation2 + $0x18] sm:$0xff] }
  0x3f   :  { %912 = vmatpush.msrb.mxu3 %v241_v10  ;;  %929 = vmatpush.msra.mxu0 %v373_v11  ;;  %v2038_v32 = vld [vmem:[#allocation2] sm:$0xff]  ;;  %v577_v40 = vld [vmem:[#allocation7 + $0xea0] sm:$0xff]  ;;  %v194_v10 = vld [vmem:[#allocation7 + $0x2a8] sm:$0xff] }
  0x40   :  { %951 = vmatpush.msra.mxu1 %v475_v12  ;;  %1768 = vmatmul.msk.f32.gmra.mxu0 %vm735_vm0, %v2028_v13  ;;  %v343_v33 = vld [vmem:[#allocation7 + $0x750] sm:$0xff]  ;;  %v433_v43 = vld [vmem:[#allocation7 + $0xa20] sm:$0xff]  ;;  %v296_v11 = vld [vmem:[#allocation7 + $0x5d8] sm:$0xff] }
  0x41   :  { %891 = vmatpush.msrb.mxu2 %v133_v14  ;;  %913 = vmatpush.msrb.mxu3 %v235_v15  ;;  %v583_v35 = vld [vmem:[#allocation7 + $0xed0] sm:$0xff]  ;;  %v673_v45 = vld [vmem:[#allocation7 + $0x11a0] sm:$0xff]  ;;  %v188_v14 = vld [vmem:[#allocation7 + $0x278] sm:$0xff] }
  0x42   :  { %1772 = vmatmul.msk.f32.gmra.mxu2 %vm735_vm0, %v2028_v13  ;;  %930 = vmatpush.msra.mxu0 %v367_v16  ;;  %v439_v39 = vld [vmem:[#allocation7 + $0xa50] sm:$0xff]  ;;  %v325_v46 = vld [vmem:[#allocation7 + $0x6c0] sm:$0xff]  ;;  %v290_v15 = vld [vmem:[#allocation7 + $0x5a8] sm:$0xff] }
  0x43   :  { %952 = vmatpush.msra.mxu1 %v469_v17  ;;  %892 = vmatpush.msrb.mxu2 %v127_v18  ;;  %v679_v41 = vld [vmem:[#allocation7 + $0x11d0] sm:$0xff]  ;;  %v565_v48 = vld [vmem:[#allocation7 + $0xe40] sm:$0xff]  ;;  %v182_v18 = vld [vmem:[#allocation7 + $0x248] sm:$0xff] }
  0x44   :  { %1770 = vmatmul.msk.f32.gmra.mxu1 %vm735_vm0, %v2028_v13  ;;  %914 = vmatpush.msrb.mxu3 %v229_v19  ;;  %v331_v42 = vld [vmem:[#allocation7 + $0x6f0] sm:$0xff]  ;;  %v2048_v50 = vld [vmem:[#allocation2 + $0x30] sm:$0xff]  ;;  %v284_v19 = vld [vmem:[#allocation7 + $0x578] sm:$0xff] }
  0x45   :  { %931 = vmatpush.msra.mxu0 %v361_v20  ;;  %1774 = vmatmul.msk.f32.gmra.mxu3 %vm735_vm0, %v2028_v13  ;;  %v571_v44 = vld [vmem:[#allocation7 + $0xe70] sm:$0xff]  ;;  %v421_v52 = vld [vmem:[#allocation7 + $0x9c0] sm:$0xff] }
  0x46   :  { %953 = vmatpush.msra.mxu1 %v463_v21  ;;  %893 = vmatpush.msrb.mxu2 %v121_v22  ;;  %v427_v47 = vld [vmem:[#allocation7 + $0x9f0] sm:$0xff]  ;;  %v661_v54 = vld [vmem:[#allocation7 + $0x1140] sm:$0xff] }
  0x47   :  { %915 = vmatpush.msrb.mxu3 %v223_v23  ;;  %932 = vmatpush.msra.mxu0 %v355_v24  ;;  %v667_v49 = vld [vmem:[#allocation7 + $0x1170] sm:$0xff]  ;;  %v313_v56 = vld [vmem:[#allocation7 + $0x660] sm:$0xff]  ;;  %v278_v23 = vld [vmem:[#allocation7 + $0x548] sm:$0xff] }
  0x48   :  { %954 = vmatpush.msra.mxu1 %v457_v25  ;;  %894 = vmatpush.msrb.mxu2 %v115_v26  ;;  %v319_v51 = vld [vmem:[#allocation7 + $0x690] sm:$0xff]  ;;  %v409_v61 = vld [vmem:[#allocation7 + $0x960] sm:$0xff]  ;;  %v176_v24 = vld [vmem:[#allocation7 + $0x218] sm:$0xff] }
  0x49   :  { %916 = vmatpush.msrb.mxu3 %v217_v27  ;;  %933 = vmatpush.msra.mxu0 %v349_v28  ;;  %v559_v53 = vld [vmem:[#allocation7 + $0xe10] sm:$0xff]  ;;  %v649_v63 = vld [vmem:[#allocation7 + $0x10e0] sm:$0xff]  ;;  %v2066_v27 = vld [vmem:[#allocation2 + $0x48] sm:$0xff] }
  0x4a   :  { %955 = vmatpush.msra.mxu1 %v451_v29  ;;  %1775 = vmatmul.msk.f32.vlgmr.msrb.gmra.mxu0 %vm735_vm0, %v2018_v58  ;;  %v415_v57 = vld [vmem:[#allocation7 + $0x990] sm:$0xff]  ;;  %v301_v0 = vld [vmem:[#allocation7 + $0x600] sm:$0xff]  ;;  %v170_v28 = vld [vmem:[#allocation7 + $0x1e8] sm:$0xff] }
  0x4b   :  { %895 = vmatpush.msrb.mxu2 %v109_v30  ;;  %917 = vmatpush.msrb.mxu3 %v211_v31  ;;  %v655_v59 = vld [vmem:[#allocation7 + $0x1110] sm:$0xff]  ;;  %v541_v2 = vld [vmem:[#allocation7 + $0xd80] sm:$0xff]  ;;  %v272_v29 = vld [vmem:[#allocation7 + $0x518] sm:$0xff] }
  0x4c   :  { %896 = vmatmul.f32.vlgmr.msrb.gmra.mxu2 %v2038_v32  ;;  %934 = vmatpush.msra.mxu0 %v343_v33  ;;  %v307_v60 = vld [vmem:[#allocation7 + $0x630] sm:$0xff]  ;;  %v2058_v4 = vld [vmem:[#allocation2 + $0x10] sm:$0xff]  ;;  %v164_v33 = vld [vmem:[#allocation7 + $0x1b8] sm:$0xff] }
  0x4d   :  { %956 = vmatpush.msra.mxu1 %v445_v34  ;;  %972 = vmatpush.msra.mxu2 %v583_v35  ;;  %v547_v62 = vld [vmem:[#allocation7 + $0xdb0] sm:$0xff]  ;;  %v397_v5 = vld [vmem:[#allocation7 + $0x900] sm:$0xff]  ;;  %v266_v34 = vld [vmem:[#allocation7 + $0x4e8] sm:$0xff] }
  0x4e   :  { %1777 = vmatmul.msk.f32.vlgmr.msrb.gmra.mxu1 %vm735_vm0, %v2018_v58  ;;  %918 = vmatpush.msrb.mxu3 %v205_v36  ;;  %v553_v58 = vld [vmem:[#allocation7 + $0xde0] sm:$0xff]  ;;  %v403_v1 = vld [vmem:[#allocation7 + $0x930] sm:$0xff] }
  0x4f   :  { %935 = vmatpush.msra.mxu0 %v337_v37  ;;  %919 = vmatmul.f32.vlgmr.msrb.gmra.mxu3 %v2043_v38  ;;  %v643_v3 = vld [vmem:[#allocation7 + $0x10b0] sm:$0xff]  ;;  %v637_v8 = vld [vmem:[#allocation7 + $0x1080] sm:$0xff]  ;;  %v158_v37 = vld [vmem:[#allocation7 + $0x188] sm:$0xff] }
  0x50   :  { %957 = vmatpush.msra.mxu1 %v439_v39  ;;  %973 = vmatpush.msra.mxu2 %v577_v40  ;;  %v535_v7 = vld [vmem:[#allocation7 + $0xd50] sm:$0xff]  ;;  %v529_v12 = vld [vmem:[#allocation7 + $0xd20] sm:$0xff]  ;;  %v260_v39 = vld [vmem:[#allocation7 + $0x4b8] sm:$0xff] }
  0x51   :  { %995 = vmatpush.msra.mxu3 %v679_v41  ;;  %936 = vmatpush.msra.mxu0 %v331_v42  ;;  %v523_v16 = vld [vmem:[#allocation7 + $0xcf0] sm:$0xff]  ;;  %v625_v17 = vld [vmem:[#allocation7 + $0x1020] sm:$0xff] }
  0x52   :  { %958 = vmatpush.msra.mxu1 %v433_v43  ;;  %974 = vmatpush.msra.mxu2 %v571_v44  ;;  %v517_v20 = vld [vmem:[#allocation7 + $0xcc0] sm:$0xff]  ;;  %v619_v21 = vld [vmem:[#allocation7 + $0xff0] sm:$0xff]  ;;  %v152_v43 = vld [vmem:[#allocation7 + $0x158] sm:$0xff] }
  0x53   :  { %996 = vmatpush.msra.mxu3 %v673_v45  ;;  %937 = vmatpush.msra.mxu0 %v325_v46  ;;  %v2064_v22 = vld [vmem:[#allocation2 + $0x40] sm:$0xff]  ;;  %v613_v26 = vld [vmem:[#allocation7 + $0xfc0] sm:$0xff]  ;;  %v254_v44 = vld [vmem:[#allocation7 + $0x488] sm:$0xff] }
  0x54   :  { %959 = vmatpush.msra.mxu1 %v427_v47  ;;  %975 = vmatpush.msra.mxu2 %v565_v48  ;;  %v511_v25 = vld [vmem:[#allocation7 + $0xc90] sm:$0xff]  ;;  %v505_v30 = vld [vmem:[#allocation7 + $0xc60] sm:$0xff]  ;;  %v392_v45 = vld [vmem:[#allocation7 + $0x8d8] sm:$0xff] }
  0x55   :  { %997 = vmatpush.msra.mxu3 %v667_v49  ;;  %1776 = vmatmul.msk.f32.gmra.mxu0 %vm735_vm0, %v2028_v13  ;;  %v607_v31 = vld [vmem:[#allocation7 + $0xf90] sm:$0xff]  ;;  %v601_v36 = vld [vmem:[#allocation7 + $0xf60] sm:$0xff]  ;;  %v146_v47 = vld [vmem:[#allocation7 + $0x128] sm:$0xff] }
  0x56   :  { %899 = vmatmul.f32.gmra.mxu2 %v2048_v50  ;;  %938 = vmatpush.msra.mxu0 %v319_v51  ;;  %v499_v35 = vld [vmem:[#allocation7 + $0xc30] sm:$0xff]  ;;  %v493_v40 = vld [vmem:[#allocation7 + $0xc00] sm:$0xff]  ;;  %v2073_v48 = vld [vmem:[#allocation2 + $0x28] sm:$0xff] }
  0x57   :  { %960 = vmatpush.msra.mxu1 %v421_v52  ;;  %976 = vmatpush.msra.mxu2 %v559_v53  ;;  %v595_v41 = vld [vmem:[#allocation7 + $0xf30] sm:$0xff]  ;;  %v589_v46 = vld [vmem:[#allocation7 + $0xf00] sm:$0xff]  ;;  %v248_v49 = vld [vmem:[#allocation7 + $0x458] sm:$0xff] }
  0x58   :  { %998 = vmatpush.msra.mxu3 %v661_v54  ;;  %1778 = vmatmul.msk.f32.gmra.mxu1 %vm735_vm0, %v2028_v13  ;;  %v631_v13 = vld [vmem:[#allocation7 + $0x1050] sm:$0xff]  ;;  %v386_v51 = vld [vmem:[#allocation7 + $0x8a8] sm:$0xff]  ;;  %v488_v52 = vld [vmem:[#allocation7 + $0xbd8] sm:$0xff] }
  0x59   :  { %922 = vmatmul.f32.gmra.mxu3 %v2053_v55  ;;  %939 = vmatpush.msra.mxu0 %v313_v56  ;;  %v2070_v42 = vld [vmem:[#allocation2 + $0x20] sm:$0xff]  ;;  %v140_v53 = vld [vmem:[#allocation7 + $0xf8] sm:$0xff]  ;;  %v242_v54 = vld [vmem:[#allocation7 + $0x428] sm:$0xff] }
  0x5a   :  { %961 = vmatpush.msra.mxu1 %v415_v57  ;;  %977 = vmatpush.msra.mxu2 %v553_v58  ;;  %v380_v56 = vld [vmem:[#allocation7 + $0x878] sm:$0xff]  ;;  %v482_v57 = vld [vmem:[#allocation7 + $0xba8] sm:$0xff] }
  0x5b   :  { %999 = vmatpush.msra.mxu3 %v655_v59  ;;  %940 = vmatpush.msra.mxu0 %v307_v60  ;;  %v134_v58 = vld [vmem:[#allocation7 + $0xc8] sm:$0xff]  ;;  %v236_v59 = vld [vmem:[#allocation7 + $0x3f8] sm:$0xff] }
  0x5c   :  { %962 = vmatpush.msra.mxu1 %v409_v61  ;;  %978 = vmatpush.msra.mxu2 %v547_v62  ;;  %v374_v60 = vld [vmem:[#allocation7 + $0x848] sm:$0xff]  ;;  %v476_v61 = vld [vmem:[#allocation7 + $0xb78] sm:$0xff]  ;;  %v2076_v62 = vld [vmem:[#allocation2 + $0x50] sm:$0xff] }
  0x5d   :  { %1000 = vmatpush.msra.mxu3 %v649_v63  ;;  %941 = vmatpush.msra.mxu0 %v301_v0  ;;  %v128_v63 = vld [vmem:[#allocation7 + $0x98] sm:$0xff]  ;;  %v230_v0 = vld [vmem:[#allocation7 + $0x3c8] sm:$0xff] }
  0x5e   :  { %963 = vmatpush.msra.mxu1 %v403_v1  ;;  %979 = vmatpush.msra.mxu2 %v541_v2  ;;  %v368_v1 = vld [vmem:[#allocation7 + $0x818] sm:$0xff]  ;;  %v470_v2 = vld [vmem:[#allocation7 + $0xb48] sm:$0xff] }
  0x5f   :  { %1001 = vmatpush.msra.mxu3 %v643_v3  ;;  %942 = vmatmul.f32.vlgmr.msra.gmra.mxu0 %v2058_v4  ;;  %v122_v3 = vld [vmem:[#allocation7 + $0x68] sm:$0xff] }
  0x60   :  { %964 = vmatpush.msra.mxu1 %v397_v5  ;;  %1018 = vmatpush.msrb.mxu0 %v200_v6  ;;  %v2079_v5 = vld [vmem:[#allocation2 + $0x58] sm:$0xff]  ;;  %v224_v6 = vld [vmem:[#allocation7 + $0x398] sm:$0xff] }
  0x61   :  { %980 = vmatpush.msra.mxu2 %v535_v7  ;;  %1002 = vmatpush.msra.mxu3 %v637_v8  ;;  %v362_v7 = vld [vmem:[#allocation7 + $0x7e8] sm:$0xff]  ;;  %v464_v8 = vld [vmem:[#allocation7 + $0xb18] sm:$0xff] }
  0x62   :  { %965 = vmatmul.f32.vlgmr.msra.gmra.mxu1 %v2060_v9  ;;  %1019 = vmatpush.msrb.mxu0 %v194_v10  ;;  %v116_v10 = vld [vmem:[#allocation7 + $0x38] sm:$0xff] }
  0x63   :  { %1041 = vmatpush.msrb.mxu1 %v296_v11  ;;  %981 = vmatpush.msra.mxu2 %v529_v12  ;;  %v218_v11 = vld [vmem:[#allocation7 + $0x368] sm:$0xff]  ;;  %v356_v12 = vld [vmem:[#allocation7 + $0x7b8] sm:$0xff] }
  0x64   :  { %1003 = vmatpush.msra.mxu3 %v631_v13  ;;  %1020 = vmatpush.msrb.mxu0 %v188_v14  ;;  %v458_v13 = vld [vmem:[#allocation7 + $0xae8] sm:$0xff] }
  0x65   :  { %1042 = vmatpush.msrb.mxu1 %v290_v15  ;;  %982 = vmatpush.msra.mxu2 %v523_v16  ;;  %v110_v14 = vld [vmem:[#allocation7 + $0x8] sm:$0xff]  ;;  %v212_v15 = vld [vmem:[#allocation7 + $0x338] sm:$0xff] }
  0x66   :  { %1004 = vmatpush.msra.mxu3 %v625_v17  ;;  %1021 = vmatpush.msrb.mxu0 %v182_v18  ;;  %v350_v16 = vld [vmem:[#allocation7 + $0x788] sm:$0xff]  ;;  %v452_v17 = vld [vmem:[#allocation7 + $0xab8] sm:$0xff] }
  0x67   :  { %1043 = vmatpush.msrb.mxu1 %v284_v19  ;;  %983 = vmatpush.msra.mxu2 %v517_v20  ;;  %v206_v18 = vld [vmem:[#allocation7 + $0x308] sm:$0xff]  ;;  %v584_v19 = vld [vmem:[#allocation7 + $0xed8] sm:$0xff] }
  0x68   :  { %1005 = vmatpush.msra.mxu3 %v619_v21  ;;  %945 = vmatmul.f32.gmra.mxu0 %v2064_v22  ;;  %v344_v20 = vld [vmem:[#allocation7 + $0x758] sm:$0xff]  ;;  %v446_v21 = vld [vmem:[#allocation7 + $0xa88] sm:$0xff] }
  0x69   :  { %1044 = vmatpush.msrb.mxu1 %v278_v23  ;;  %1022 = vmatpush.msrb.mxu0 %v176_v24  ;;  %v578_v23 = vld [vmem:[#allocation7 + $0xea8] sm:$0xff]  ;;  %v680_v24 = vld [vmem:[#allocation7 + $0x11d8] sm:$0xff] }
  0x6a   :  { %984 = vmatpush.msra.mxu2 %v511_v25  ;;  %1006 = vmatpush.msra.mxu3 %v613_v26  ;;  %v338_v25 = vld [vmem:[#allocation7 + $0x728] sm:$0xff]  ;;  %v440_v26 = vld [vmem:[#allocation7 + $0xa58] sm:$0xff] }
  0x6b   :  { %968 = vmatmul.f32.gmra.mxu1 %v2066_v27  ;;  %1023 = vmatpush.msrb.mxu0 %v170_v28  ;;  %v572_v28 = vld [vmem:[#allocation7 + $0xe78] sm:$0xff] }
  0x6c   :  { %1045 = vmatpush.msrb.mxu1 %v272_v29  ;;  %985 = vmatpush.msra.mxu2 %v505_v30  ;;  %v674_v29 = vld [vmem:[#allocation7 + $0x11a8] sm:$0xff]  ;;  %v332_v30 = vld [vmem:[#allocation7 + $0x6f8] sm:$0xff] }
  0x6d   :  { %1007 = vmatpush.msra.mxu3 %v607_v31  ;;  %1024 = vmatpush.msrb.mxu0 %v164_v33  ;;  %v434_v31 = vld [vmem:[#allocation7 + $0xa28] sm:$0xff] }
  0x6e   :  { %1046 = vmatpush.msrb.mxu1 %v266_v34  ;;  %986 = vmatpush.msra.mxu2 %v499_v35  ;;  %v566_v33 = vld [vmem:[#allocation7 + $0xe48] sm:$0xff]  ;;  %v668_v34 = vld [vmem:[#allocation7 + $0x1178] sm:$0xff] }
  0x6f   :  { %1008 = vmatpush.msra.mxu3 %v601_v36  ;;  %1025 = vmatpush.msrb.mxu0 %v158_v37  ;;  %v326_v35 = vld [vmem:[#allocation7 + $0x6c8] sm:$0xff]  ;;  %v428_v36 = vld [vmem:[#allocation7 + $0x9f8] sm:$0xff] }
  0x70   :  { %1047 = vmatpush.msrb.mxu1 %v260_v39  ;;  %987 = vmatpush.msra.mxu2 %v493_v40  ;;  %v662_v37 = vld [vmem:[#allocation7 + $0x1148] sm:$0xff]  ;;  %v560_v39 = vld [vmem:[#allocation7 + $0xe18] sm:$0xff] }
  0x71   :  { %1009 = vmatpush.msra.mxu3 %v595_v41  ;;  %988 = vmatmul.f32.vlgmr.msra.gmra.mxu2 %v2070_v42  ;;  %v320_v40 = vld [vmem:[#allocation7 + $0x698] sm:$0xff]  ;;  %v422_v41 = vld [vmem:[#allocation7 + $0x9c8] sm:$0xff] }
  0x72   :  { %1026 = vmatpush.msrb.mxu0 %v152_v43  ;;  %1048 = vmatpush.msrb.mxu1 %v254_v44  ;;  %v554_v43 = vld [vmem:[#allocation7 + $0xde8] sm:$0xff]  ;;  %v656_v44 = vld [vmem:[#allocation7 + $0x1118] sm:$0xff] }
  0x73   :  { %1064 = vmatpush.msrb.mxu2 %v392_v45  ;;  %1010 = vmatpush.msra.mxu3 %v589_v46  ;;  %v314_v45 = vld [vmem:[#allocation7 + $0x668] sm:$0xff]  ;;  %v416_v46 = vld [vmem:[#allocation7 + $0x998] sm:$0xff] }
  0x74   :  { %1027 = vmatpush.msrb.mxu0 %v146_v47  ;;  %1011 = vmatmul.f32.vlgmr.msra.gmra.mxu3 %v2073_v48  ;;  %v548_v47 = vld [vmem:[#allocation7 + $0xdb8] sm:$0xff] }
  0x75   :  { %1049 = vmatpush.msrb.mxu1 %v248_v49  ;;  %1065 = vmatpush.msrb.mxu2 %v386_v51  ;;  %v650_v49 = vld [vmem:[#allocation7 + $0x10e8] sm:$0xff]  ;;  %v308_v51 = vld [vmem:[#allocation7 + $0x638] sm:$0xff] }
  0x76   :  { %1087 = vmatpush.msrb.mxu3 %v488_v52  ;;  %1028 = vmatpush.msrb.mxu0 %v140_v53  ;;  %v410_v52 = vld [vmem:[#allocation7 + $0x968] sm:$0xff] }
  0x77   :  { %1050 = vmatpush.msrb.mxu1 %v242_v54  ;;  %1066 = vmatpush.msrb.mxu2 %v380_v56  ;;  %v542_v53 = vld [vmem:[#allocation7 + $0xd88] sm:$0xff]  ;;  %v644_v54 = vld [vmem:[#allocation7 + $0x10b8] sm:$0xff] }
  0x78   :  { %1088 = vmatpush.msrb.mxu3 %v482_v57  ;;  %1029 = vmatpush.msrb.mxu0 %v134_v58  ;;  %v302_v56 = vld [vmem:[#allocation7 + $0x608] sm:$0xff]  ;;  %v404_v57 = vld [vmem:[#allocation7 + $0x938] sm:$0xff] }
  0x79   :  { %1051 = vmatpush.msrb.mxu1 %v236_v59  ;;  %1067 = vmatpush.msrb.mxu2 %v374_v60  ;;  %v536_v58 = vld [vmem:[#allocation7 + $0xd58] sm:$0xff]  ;;  %v638_v59 = vld [vmem:[#allocation7 + $0x1088] sm:$0xff]  ;;  %v201_v60 = vld [vmem:[#allocation7 + $0x2e0] sm:$0xff] }
  0x7a   :  { %1089 = vmatpush.msrb.mxu3 %v476_v61  ;;  %991 = vmatmul.f32.gmra.mxu2 %v2076_v62  ;;  %v398_v61 = vld [vmem:[#allocation7 + $0x908] sm:$0xff] }
  0x7b   :  { %1030 = vmatpush.msrb.mxu0 %v128_v63  ;;  %1052 = vmatpush.msrb.mxu1 %v230_v0  ;;  %v530_v63 = vld [vmem:[#allocation7 + $0xd28] sm:$0xff]  ;;  %v632_v0 = vld [vmem:[#allocation7 + $0x1058] sm:$0xff] }
  0x7c   :  { %1068 = vmatpush.msrb.mxu2 %v368_v1  ;;  %1090 = vmatpush.msrb.mxu3 %v470_v2  ;;  %v195_v1 = vld [vmem:[#allocation7 + $0x2b0] sm:$0xff]  ;;  %v297_v2 = vld [vmem:[#allocation7 + $0x5e0] sm:$0xff] }
  0x7d   :  { %1031 = vmatpush.msrb.mxu0 %v122_v3  ;;  %1014 = vmatmul.f32.gmra.mxu3 %v2079_v5  ;;  %v524_v3 = vld [vmem:[#allocation7 + $0xcf8] sm:$0xff] }
  0x7e   :  { %1053 = vmatpush.msrb.mxu1 %v224_v6  ;;  %1069 = vmatpush.msrb.mxu2 %v362_v7  ;;  %v626_v6 = vld [vmem:[#allocation7 + $0x1028] sm:$0xff]  ;;  %v189_v7 = vld [vmem:[#allocation7 + $0x280] sm:$0xff] }
  0x7f   :  { %1091 = vmatpush.msrb.mxu3 %v464_v8  ;;  %1032 = vmatpush.msrb.mxu0 %v116_v10  ;;  %v291_v8 = vld [vmem:[#allocation7 + $0x5b0] sm:$0xff]  ;;  %v518_v10 = vld [vmem:[#allocation7 + $0xcc8] sm:$0xff] }
  0x80   :  { %1054 = vmatpush.msrb.mxu1 %v218_v11  ;;  %1070 = vmatpush.msrb.mxu2 %v356_v12  ;;  %v620_v11 = vld [vmem:[#allocation7 + $0xff8] sm:$0xff]  ;;  %v183_v12 = vld [vmem:[#allocation7 + $0x250] sm:$0xff] }
  0x81   :  { %1092 = vmatpush.msrb.mxu3 %v458_v13  ;;  %1033 = vmatpush.msrb.mxu0 %v110_v14  ;;  %v285_v13 = vld [vmem:[#allocation7 + $0x580] sm:$0xff]  ;;  %v512_v14 = vld [vmem:[#allocation7 + $0xc98] sm:$0xff] }
  0x82   :  { %1055 = vmatpush.msrb.mxu1 %v212_v15  ;;  %1071 = vmatpush.msrb.mxu2 %v350_v16  ;;  %v614_v15 = vld [vmem:[#allocation7 + $0xfc8] sm:$0xff]  ;;  %v177_v16 = vld [vmem:[#allocation7 + $0x220] sm:$0xff] }
  0x83   :  { %1093 = vmatpush.msrb.mxu3 %v452_v17  ;;  %1034 = vmatmul.f32.vlgmr.msrb.gmra.mxu0 %v2038_v32  ;;  %v279_v17 = vld [vmem:[#allocation7 + $0x550] sm:$0xff] }
  0x84   :  { %1056 = vmatpush.msrb.mxu1 %v206_v18  ;;  %1110 = vmatpush.msra.mxu0 %v584_v19  ;;  %v506_v18 = vld [vmem:[#allocation7 + $0xc68] sm:$0xff]  ;;  %v608_v19 = vld [vmem:[#allocation7 + $0xf98] sm:$0xff] }
  0x85   :  { %1072 = vmatpush.msrb.mxu2 %v344_v20  ;;  %1094 = vmatpush.msrb.mxu3 %v446_v21  ;;  %v171_v20 = vld [vmem:[#allocation7 + $0x1f0] sm:$0xff]  ;;  %v273_v21 = vld [vmem:[#allocation7 + $0x520] sm:$0xff] }
  0x86   :  { %1057 = vmatmul.f32.vlgmr.msrb.gmra.mxu1 %v2043_v38  ;;  %1111 = vmatpush.msra.mxu0 %v578_v23  ;;  %v500_v23 = vld [vmem:[#allocation7 + $0xc38] sm:$0xff] }
  0x87   :  { %1133 = vmatpush.msra.mxu1 %v680_v24  ;;  %1073 = vmatpush.msrb.mxu2 %v338_v25  ;;  %v602_v24 = vld [vmem:[#allocation7 + $0xf68] sm:$0xff]  ;;  %v165_v25 = vld [vmem:[#allocation7 + $0x1c0] sm:$0xff] }
  0x88   :  { %1095 = vmatpush.msrb.mxu3 %v440_v26  ;;  %1112 = vmatpush.msra.mxu0 %v572_v28  ;;  %v267_v26 = vld [vmem:[#allocation7 + $0x4f0] sm:$0xff]  ;;  %v494_v28 = vld [vmem:[#allocation7 + $0xc08] sm:$0xff] }
  0x89   :  { %1134 = vmatpush.msra.mxu1 %v674_v29  ;;  %1074 = vmatpush.msrb.mxu2 %v332_v30  ;;  %v596_v29 = vld [vmem:[#allocation7 + $0xf38] sm:$0xff]  ;;  %v159_v30 = vld [vmem:[#allocation7 + $0x190] sm:$0xff] }
  0x8a   :  { %1096 = vmatpush.msrb.mxu3 %v434_v31  ;;  %1113 = vmatpush.msra.mxu0 %v566_v33  ;;  %v261_v31 = vld [vmem:[#allocation7 + $0x4c0] sm:$0xff]  ;;  %v590_v33 = vld [vmem:[#allocation7 + $0xf08] sm:$0xff] }
  0x8b   :  { %1135 = vmatpush.msra.mxu1 %v668_v34  ;;  %1075 = vmatpush.msrb.mxu2 %v326_v35  ;;  %v393_v34 = vld [vmem:[#allocation7 + $0x8e0] sm:$0xff] }
  0x8c   :  { %1097 = vmatpush.msrb.mxu3 %v428_v36  ;;  %1037 = vmatmul.f32.gmra.mxu0 %v2048_v50  ;;  %v153_v35 = vld [vmem:[#allocation7 + $0x160] sm:$0xff]  ;;  %v255_v36 = vld [vmem:[#allocation7 + $0x490] sm:$0xff] }
  0x8d   :  { %1136 = vmatpush.msra.mxu1 %v662_v37  ;;  %1114 = vmatpush.msra.mxu0 %v560_v39  ;;  %v387_v37 = vld [vmem:[#allocation7 + $0x8b0] sm:$0xff]  ;;  %v489_v39 = vld [vmem:[#allocation7 + $0xbe0] sm:$0xff] }
  0x8e   :  { %1076 = vmatpush.msrb.mxu2 %v320_v40  ;;  %1098 = vmatpush.msrb.mxu3 %v422_v41  ;;  %v147_v40 = vld [vmem:[#allocation7 + $0x130] sm:$0xff]  ;;  %v249_v41 = vld [vmem:[#allocation7 + $0x460] sm:$0xff] }
  0x8f   :  { %1060 = vmatmul.f32.gmra.mxu1 %v2053_v55  ;;  %1115 = vmatpush.msra.mxu0 %v554_v43  ;;  %v381_v43 = vld [vmem:[#allocation7 + $0x880] sm:$0xff] }
  0x90   :  { %1137 = vmatpush.msra.mxu1 %v656_v44  ;;  %1077 = vmatpush.msrb.mxu2 %v314_v45  ;;  %v483_v44 = vld [vmem:[#allocation7 + $0xbb0] sm:$0xff]  ;;  %v141_v45 = vld [vmem:[#allocation7 + $0x100] sm:$0xff] }
  0x91   :  { %1099 = vmatpush.msrb.mxu3 %v416_v46  ;;  %1116 = vmatpush.msra.mxu0 %v548_v47  ;;  %v243_v46 = vld [vmem:[#allocation7 + $0x430] sm:$0xff] }
  0x92   :  { %1138 = vmatpush.msra.mxu1 %v650_v49  ;;  %1078 = vmatpush.msrb.mxu2 %v308_v51  ;;  %v375_v47 = vld [vmem:[#allocation7 + $0x850] sm:$0xff]  ;;  %v477_v49 = vld [vmem:[#allocation7 + $0xb80] sm:$0xff] }
  0x93   :  { %1100 = vmatpush.msrb.mxu3 %v410_v52  ;;  %1117 = vmatpush.msra.mxu0 %v542_v53  ;;  %v135_v51 = vld [vmem:[#allocation7 + $0xd0] sm:$0xff]  ;;  %v237_v52 = vld [vmem:[#allocation7 + $0x400] sm:$0xff] }
  0x94   :  { %1139 = vmatpush.msra.mxu1 %v644_v54  ;;  %1079 = vmatpush.msrb.mxu2 %v302_v56  ;;  %v471_v53 = vld [vmem:[#allocation7 + $0xb50] sm:$0xff]  ;;  %v369_v54 = vld [vmem:[#allocation7 + $0x820] sm:$0xff] }
  0x95   :  { %1101 = vmatpush.msrb.mxu3 %v404_v57  ;;  %1080 = vmatmul.f32.vlgmr.msrb.gmra.mxu2 %v2058_v4  ;;  %v129_v56 = vld [vmem:[#allocation7 + $0xa0] sm:$0xff]  ;;  %v231_v57 = vld [vmem:[#allocation7 + $0x3d0] sm:$0xff] }
  0x96   :  { %1118 = vmatpush.msra.mxu0 %v536_v58  ;;  %1140 = vmatpush.msra.mxu1 %v638_v59  ;;  %v363_v58 = vld [vmem:[#allocation7 + $0x7f0] sm:$0xff]  ;;  %v465_v59 = vld [vmem:[#allocation7 + $0xb20] sm:$0xff] }
  0x97   :  { %1156 = vmatpush.msra.mxu2 %v201_v60  ;;  %1102 = vmatpush.msrb.mxu3 %v398_v61  ;;  %v123_v60 = vld [vmem:[#allocation7 + $0x70] sm:$0xff]  ;;  %v225_v61 = vld [vmem:[#allocation7 + $0x3a0] sm:$0xff] }
  0x98   :  { %1119 = vmatpush.msra.mxu0 %v530_v63  ;;  %1103 = vmatmul.f32.vlgmr.msrb.gmra.mxu3 %v2060_v9  ;;  %v357_v63 = vld [vmem:[#allocation7 + $0x7c0] sm:$0xff] }
  0x99   :  { %1141 = vmatpush.msra.mxu1 %v632_v0  ;;  %1157 = vmatpush.msra.mxu2 %v195_v1  ;;  %v459_v0 = vld [vmem:[#allocation7 + $0xaf0] sm:$0xff]  ;;  %v117_v1 = vld [vmem:[#allocation7 + $0x40] sm:$0xff] }
  0x9a   :  { %1179 = vmatpush.msra.mxu3 %v297_v2  ;;  %1120 = vmatpush.msra.mxu0 %v524_v3  ;;  %v219_v2 = vld [vmem:[#allocation7 + $0x370] sm:$0xff] }
  0x9b   :  { %1142 = vmatpush.msra.mxu1 %v626_v6  ;;  %1158 = vmatpush.msra.mxu2 %v189_v7  ;;  %v351_v3 = vld [vmem:[#allocation7 + $0x790] sm:$0xff]  ;;  %v453_v6 = vld [vmem:[#allocation7 + $0xac0] sm:$0xff] }
  0x9c   :  { %1180 = vmatpush.msra.mxu3 %v291_v8  ;;  %1121 = vmatpush.msra.mxu0 %v518_v10  ;;  %v111_v7 = vld [vmem:[#allocation7 + $0x10] sm:$0xff]  ;;  %v213_v8 = vld [vmem:[#allocation7 + $0x340] sm:$0xff] }
  0x9d   :  { %1143 = vmatpush.msra.mxu1 %v620_v11  ;;  %1159 = vmatpush.msra.mxu2 %v183_v12  ;;  %v345_v10 = vld [vmem:[#allocation7 + $0x760] sm:$0xff]  ;;  %v447_v11 = vld [vmem:[#allocation7 + $0xa90] sm:$0xff] }
  0x9e   :  { %1181 = vmatpush.msra.mxu3 %v285_v13  ;;  %1083 = vmatmul.f32.gmra.mxu2 %v2064_v22  ;;  %v585_v12 = vld [vmem:[#allocation7 + $0xee0] sm:$0xff]  ;;  %v207_v13 = vld [vmem:[#allocation7 + $0x310] sm:$0xff] }
  0x9f   :  { %1122 = vmatpush.msra.mxu0 %v512_v14  ;;  %1144 = vmatpush.msra.mxu1 %v614_v15  ;;  %v339_v14 = vld [vmem:[#allocation7 + $0x730] sm:$0xff]  ;;  %v441_v15 = vld [vmem:[#allocation7 + $0xa60] sm:$0xff] }
  0xa0   :  { %1160 = vmatpush.msra.mxu2 %v177_v16  ;;  %1182 = vmatpush.msra.mxu3 %v279_v17  ;;  %v579_v16 = vld [vmem:[#allocation7 + $0xeb0] sm:$0xff]  ;;  %v681_v17 = vld [vmem:[#allocation7 + $0x11e0] sm:$0xff] }
  0xa1   :  { %1123 = vmatpush.msra.mxu0 %v506_v18  ;;  %1106 = vmatmul.f32.gmra.mxu3 %v2066_v27  ;;  %v333_v18 = vld [vmem:[#allocation7 + $0x700] sm:$0xff] }
  0xa2   :  { %1145 = vmatpush.msra.mxu1 %v608_v19  ;;  %1161 = vmatpush.msra.mxu2 %v171_v20  ;;  %v435_v19 = vld [vmem:[#allocation7 + $0xa30] sm:$0xff]  ;;  %v573_v20 = vld [vmem:[#allocation7 + $0xe80] sm:$0xff] }
  0xa3   :  { %1183 = vmatpush.msra.mxu3 %v273_v21  ;;  %1124 = vmatpush.msra.mxu0 %v500_v23  ;;  %v675_v21 = vld [vmem:[#allocation7 + $0x11b0] sm:$0xff] }
  0xa4   :  { %1146 = vmatpush.msra.mxu1 %v602_v24  ;;  %1162 = vmatpush.msra.mxu2 %v165_v25  ;;  %v327_v23 = vld [vmem:[#allocation7 + $0x6d0] sm:$0xff]  ;;  %v429_v24 = vld [vmem:[#allocation7 + $0xa00] sm:$0xff] }
  0xa5   :  { %1184 = vmatpush.msra.mxu3 %v267_v26  ;;  %1125 = vmatpush.msra.mxu0 %v494_v28  ;;  %v669_v25 = vld [vmem:[#allocation7 + $0x1180] sm:$0xff]  ;;  %v423_v28 = vld [vmem:[#allocation7 + $0x9d0] sm:$0xff] }
  0xa6   :  { %1147 = vmatpush.msra.mxu1 %v596_v29  ;;  %1163 = vmatpush.msra.mxu2 %v159_v30  ;;  %v321_v26 = vld [vmem:[#allocation7 + $0x6a0] sm:$0xff]  ;;  %v315_v30 = vld [vmem:[#allocation7 + $0x670] sm:$0xff] }
  0xa7   :  { %1185 = vmatpush.msra.mxu3 %v261_v31  ;;  %1126 = vmatmul.f32.vlgmr.msra.gmra.mxu0 %v2070_v42  ;;  %v561_v29 = vld [vmem:[#allocation7 + $0xe20] sm:$0xff] }
  0xa8   :  { %1148 = vmatpush.msra.mxu1 %v590_v33  ;;  %1202 = vmatpush.msrb.mxu0 %v393_v34  ;;  %v417_v31 = vld [vmem:[#allocation7 + $0x9a0] sm:$0xff]  ;;  %v555_v33 = vld [vmem:[#allocation7 + $0xdf0] sm:$0xff] }
  0xa9   :  { %1164 = vmatpush.msra.mxu2 %v153_v35  ;;  %1186 = vmatpush.msra.mxu3 %v255_v36  ;;  %v657_v34 = vld [vmem:[#allocation7 + $0x1120] sm:$0xff] }
  0xaa   :  { %1149 = vmatmul.f32.vlgmr.msra.gmra.mxu1 %v2073_v48  ;;  %1203 = vmatpush.msrb.mxu0 %v387_v37  ;;  %v309_v36 = vld [vmem:[#allocation7 + $0x640] sm:$0xff]  ;;  %v411_v37 = vld [vmem:[#allocation7 + $0x970] sm:$0xff] }
  0xab   :  { %1225 = vmatpush.msrb.mxu1 %v489_v39  ;;  %1165 = vmatpush.msra.mxu2 %v147_v40  ;;  %v549_v39 = vld [vmem:[#allocation7 + $0xdc0] sm:$0xff]  ;;  %v651_v40 = vld [vmem:[#allocation7 + $0x10f0] sm:$0xff] }
  0xac   :  { %1187 = vmatpush.msra.mxu3 %v249_v41  ;;  %1204 = vmatpush.msrb.mxu0 %v381_v43  ;;  %v405_v41 = vld [vmem:[#allocation7 + $0x940] sm:$0xff]  ;;  %v543_v43 = vld [vmem:[#allocation7 + $0xd90] sm:$0xff] }
  0xad   :  { %1226 = vmatpush.msrb.mxu1 %v483_v44  ;;  %1166 = vmatpush.msra.mxu2 %v141_v45  ;;  %v645_v44 = vld [vmem:[#allocation7 + $0x10c0] sm:$0xff] }
  0xae   :  { %1188 = vmatpush.msra.mxu3 %v243_v46  ;;  %1205 = vmatpush.msrb.mxu0 %v375_v47  ;;  %v399_v46 = vld [vmem:[#allocation7 + $0x910] sm:$0xff]  ;;  %v202_v47 = vld [vmem:[#allocation7 + $0x2e8] sm:$0xff] }
  0xaf   :  { %1227 = vmatpush.msrb.mxu1 %v477_v49  ;;  %1167 = vmatpush.msra.mxu2 %v135_v51  ;;  %v639_v49 = vld [vmem:[#allocation7 + $0x1090] sm:$0xff]  ;;  %v196_v51 = vld [vmem:[#allocation7 + $0x2b8] sm:$0xff] }
  0xb0   :  { %1189 = vmatpush.msra.mxu3 %v237_v52  ;;  %1129 = vmatmul.f32.gmra.mxu0 %v2076_v62  ;;  %v298_v52 = vld [vmem:[#allocation7 + $0x5e8] sm:$0xff] }
  0xb1   :  { %1228 = vmatpush.msrb.mxu1 %v471_v53  ;;  %1206 = vmatpush.msrb.mxu0 %v369_v54  ;;  %v531_v53 = vld [vmem:[#allocation7 + $0xd30] sm:$0xff]  ;;  %v633_v54 = vld [vmem:[#allocation7 + $0x1060] sm:$0xff] }
  0xb2   :  { %1168 = vmatpush.msra.mxu2 %v129_v56  ;;  %1190 = vmatpush.msra.mxu3 %v231_v57  ;;  %v2097_v35 = vpop.f32.mrf.mxu0  ;;  %v190_v56 = vld [vmem:[#allocation7 + $0x288] sm:$0xff]  ;;  %v292_v57 = vld [vmem:[#allocation7 + $0x5b8] sm:$0xff] }
  0xb3   :  { %1152 = vmatmul.f32.gmra.mxu1 %v2079_v5  ;;  %1207 = vmatpush.msrb.mxu0 %v363_v58 }
  0xb4   :  { %1229 = vmatpush.msrb.mxu1 %v465_v59  ;;  %1169 = vmatpush.msra.mxu2 %v123_v60  ;;  %v525_v59 = vld [vmem:[#allocation7 + $0xd00] sm:$0xff]  ;;  %v627_v60 = vld [vmem:[#allocation7 + $0x1030] sm:$0xff] }
  0xb5   :  { %1191 = vmatpush.msra.mxu3 %v225_v61  ;;  %1208 = vmatpush.msrb.mxu0 %v357_v63  ;;  %v286_v63 = vld [vmem:[#allocation7 + $0x588] sm:$0xff] }
  0xb6   :  { %1230 = vmatpush.msrb.mxu1 %v459_v0  ;;  %1170 = vmatpush.msra.mxu2 %v117_v1  ;;  %v2100_v45 = vpop.f32.mrf.mxu1  ;;  %v519_v0 = vld [vmem:[#allocation7 + $0xcd0] sm:$0xff]  ;;  %v621_v1 = vld [vmem:[#allocation7 + $0x1000] sm:$0xff] }
  0xb7   :  { %1192 = vmatpush.msra.mxu3 %v219_v2  ;;  %1209 = vmatpush.msrb.mxu0 %v351_v3 }
  0xb8   :  { %1231 = vmatpush.msrb.mxu1 %v453_v6  ;;  %1171 = vmatpush.msra.mxu2 %v111_v7  ;;  %v178_v6 = vld [vmem:[#allocation7 + $0x228] sm:$0xff]  ;;  %v513_v7 = vld [vmem:[#allocation7 + $0xca0] sm:$0xff] }
  0xb9   :  { %1193 = vmatpush.msra.mxu3 %v213_v8  ;;  %1172 = vmatmul.f32.vlgmr.msra.gmra.mxu2 %v2038_v32  ;;  %v567_v32 = vld [vmem:[#allocation7 + $0xe50] sm:$0xff] }
  0xba   :  { %1210 = vmatpush.msrb.mxu0 %v345_v10  ;;  %1232 = vmatpush.msrb.mxu1 %v447_v11  ;;  %v615_v8 = vld [vmem:[#allocation7 + $0xfd0] sm:$0xff]  ;;  %v172_v10 = vld [vmem:[#allocation7 + $0x1f8] sm:$0xff]  ;;  %v274_v11 = vld [vmem:[#allocation7 + $0x528] sm:$0xff] }
  0xbb   :  { %1248 = vmatpush.msrb.mxu2 %v585_v12  ;;  %1194 = vmatpush.msra.mxu3 %v207_v13  ;;  %v2106_v61 = vpop.f32.mrf.mxu2  ;;  %v507_v12 = vld [vmem:[#allocation7 + $0xc70] sm:$0xff]  ;;  %v609_v13 = vld [vmem:[#allocation7 + $0xfa0] sm:$0xff] }
  0xbc   :  { %1211 = vmatpush.msrb.mxu0 %v339_v14  ;;  %1195 = vmatmul.f32.vlgmr.msra.gmra.mxu3 %v2043_v38  ;;  %v663_v38 = vld [vmem:[#allocation7 + $0x1150] sm:$0xff]  ;;  %v166_v14 = vld [vmem:[#allocation7 + $0x1c8] sm:$0xff] }
  0xbd   :  { %1233 = vmatpush.msrb.mxu1 %v441_v15  ;;  %1249 = vmatpush.msrb.mxu2 %v579_v16  ;;  %v2104_v58 = vpop.f32.mrf.mxu0  ;;  %v268_v15 = vld [vmem:[#allocation7 + $0x4f8] sm:$0xff]  ;;  %v501_v16 = vld [vmem:[#allocation7 + $0xc40] sm:$0xff] }
  0xbe   :  { %1271 = vmatpush.msrb.mxu3 %v681_v17  ;;  %1212 = vmatpush.msrb.mxu0 %v333_v18  ;;  %v2108_v2 = vpop.f32.mrf.mxu3  ;;  %v603_v17 = vld [vmem:[#allocation7 + $0xf70] sm:$0xff] }
  0xbf   :  { %1234 = vmatpush.msrb.mxu1 %v435_v19  ;;  %1250 = vmatpush.msrb.mxu2 %v573_v20  ;;  %v262_v19 = vld [vmem:[#allocation7 + $0x4c8] sm:$0xff] }
  0xc0   :  { %1272 = vmatpush.msrb.mxu3 %v675_v21  ;;  %1213 = vmatpush.msrb.mxu0 %v327_v23  ;;  %v495_v21 = vld [vmem:[#allocation7 + $0xc10] sm:$0xff]  ;;  %v597_v23 = vld [vmem:[#allocation7 + $0xf40] sm:$0xff] }
  0xc1   :  { %1235 = vmatpush.msrb.mxu1 %v429_v24  ;;  %1251 = vmatpush.msrb.mxu2 %v567_v32  ;;  %v2110_v3 = vpop.f32.mrf.mxu1  ;;  %v256_v24 = vld [vmem:[#allocation7 + $0x498] sm:$0xff]  ;;  %v394_v32 = vld [vmem:[#allocation7 + $0x8e8] sm:$0xff] }
  0xc2   :  { %1273 = vmatpush.msrb.mxu3 %v669_v25  ;;  %1175 = vmatmul.f32.gmra.mxu2 %v2048_v50  ;;  %v303_v50 = vld [vmem:[#allocation7 + $0x610] sm:$0xff] }
  0xc3   :  { %1214 = vmatpush.msrb.mxu0 %v321_v26  ;;  %1236 = vmatpush.msrb.mxu1 %v423_v28  ;;  %v591_v28 = vld [vmem:[#allocation7 + $0xf10] sm:$0xff] }
  0xc4   :  { %1252 = vmatpush.msrb.mxu2 %v561_v29  ;;  %1274 = vmatpush.msrb.mxu3 %v663_v38  ;;  %v148_v29 = vld [vmem:[#allocation7 + $0x138] sm:$0xff]  ;;  %v250_v38 = vld [vmem:[#allocation7 + $0x468] sm:$0xff] }
  0xc5   :  { %1215 = vmatpush.msrb.mxu0 %v315_v30  ;;  %1198 = vmatmul.f32.gmra.mxu3 %v2053_v55  ;;  %v537_v55 = vld [vmem:[#allocation7 + $0xd60] sm:$0xff]  ;;  %v2116_v20 = vpop.f32.mrf.mxu2  ;;  %v388_v30 = vld [vmem:[#allocation7 + $0x8b8] sm:$0xff] }
  0xc6   :  { %1237 = vmatpush.msrb.mxu1 %v417_v31  ;;  %1253 = vmatpush.msrb.mxu2 %v555_v33  ;;  %v490_v31 = vld [vmem:[#allocation7 + $0xbe8] sm:$0xff] }
  0xc7   :  { %1275 = vmatpush.msrb.mxu3 %v657_v34  ;;  %1216 = vmatpush.msrb.mxu0 %v309_v36  ;;  %v2114_v18 = vpop.f32.mrf.mxu0  ;;  %v142_v33 = vld [vmem:[#allocation7 + $0x108] sm:$0xff]  ;;  %v244_v34 = vld [vmem:[#allocation7 + $0x438] sm:$0xff] }
  0xc8   :  { %1238 = vmatpush.msrb.mxu1 %v411_v37  ;;  %1254 = vmatpush.msrb.mxu2 %v549_v39  ;;  %v2118_v25 = vpop.f32.mrf.mxu3  ;;  %v382_v36 = vld [vmem:[#allocation7 + $0x888] sm:$0xff]  ;;  %v484_v37 = vld [vmem:[#allocation7 + $0xbb8] sm:$0xff] }
  0xc9   :  { %1276 = vmatpush.msrb.mxu3 %v651_v40  ;;  %1217 = vmatpush.msrb.mxu0 %v303_v50  ;;  %v136_v39 = vld [vmem:[#allocation7 + $0xd8] sm:$0xff]  ;;  %v238_v40 = vld [vmem:[#allocation7 + $0x408] sm:$0xff] }
  0xca   :  { %1239 = vmatpush.msrb.mxu1 %v405_v41  ;;  %1255 = vmatpush.msrb.mxu2 %v543_v43  ;;  %v376_v50 = vld [vmem:[#allocation7 + $0x858] sm:$0xff]  ;;  %v478_v41 = vld [vmem:[#allocation7 + $0xb88] sm:$0xff] }
  0xcb   :  { %1277 = vmatpush.msrb.mxu3 %v645_v44  ;;  %1218 = vmatmul.f32.vlgmr.msrb.gmra.mxu0 %v2058_v4  ;;  %v184_v4 = vld [vmem:[#allocation7 + $0x258] sm:$0xff]  ;;  %v2120_v26 = vpop.f32.mrf.mxu1  ;;  %v130_v44 = vld [vmem:[#allocation7 + $0xa8] sm:$0xff] }
  0xcc   :  { %1240 = vmatpush.msrb.mxu1 %v399_v46  ;;  %1294 = vmatpush.msra.mxu0 %v202_v47  ;;  %v370_v46 = vld [vmem:[#allocation7 + $0x828] sm:$0xff]  ;;  %v472_v47 = vld [vmem:[#allocation7 + $0xb58] sm:$0xff] }
  0xcd   :  { %1256 = vmatpush.msrb.mxu2 %v537_v55  ;;  %1278 = vmatpush.msrb.mxu3 %v639_v49 }
  0xce   :  { %1241 = vmatmul.f32.vlgmr.msrb.gmra.mxu1 %v2060_v9  ;;  %1295 = vmatpush.msra.mxu0 %v196_v51  ;;  %v280_v9 = vld [vmem:[#allocation7 + $0x558] sm:$0xff] }
  0xcf   :  { %1317 = vmatpush.msra.mxu1 %v298_v52  ;;  %1257 = vmatpush.msrb.mxu2 %v531_v53  ;;  %v897_v43 = vpop.f32.mrf.mxu2  ;;  %v124_v51 = vld [vmem:[#allocation7 + $0x78] sm:$0xff]  ;;  %v226_v52 = vld [vmem:[#allocation7 + $0x3a8] sm:$0xff] }
  0xd0   :  { %1279 = vmatpush.msrb.mxu3 %v633_v54  ;;  %1296 = vmatpush.msra.mxu0 %v190_v56  ;;  %v364_v53 = vld [vmem:[#allocation7 + $0x7f8] sm:$0xff]  ;;  %v466_v54 = vld [vmem:[#allocation7 + $0xb28] sm:$0xff] }
  0xd1   :  { %1318 = vmatpush.msra.mxu1 %v292_v57  ;;  %1258 = vmatpush.msrb.mxu2 %v525_v59  ;;  %v118_v56 = vld [vmem:[#allocation7 + $0x48] sm:$0xff]  ;;  %v220_v57 = vld [vmem:[#allocation7 + $0x378] sm:$0xff]  ;;  %v898_v59 = vadd.f32 %v897_v43, %v2097_v35 }
  0xd2   :  { %1280 = vmatpush.msrb.mxu3 %v627_v60  ;;  %1297 = vmatpush.msra.mxu0 %v184_v4  ;;  %v920_v55 = vpop.f32.mrf.mxu3  ;;  %v358_v60 = vld [vmem:[#allocation7 + $0x7c8] sm:$0xff]  ;;  %v460_v4 = vld [vmem:[#allocation7 + $0xaf8] sm:$0xff] }
  0xd3   :  { %1319 = vmatpush.msra.mxu1 %v286_v63  ;;  %1259 = vmatpush.msrb.mxu2 %v519_v0  ;;  %v214_v63 = vld [vmem:[#allocation7 + $0x348] sm:$0xff]  ;;  %v352_v0 = vld [vmem:[#allocation7 + $0x798] sm:$0xff] }
  0xd4   :  { %1281 = vmatpush.msrb.mxu3 %v621_v1  ;;  %1221 = vmatmul.f32.gmra.mxu0 %v2064_v22  ;;  %v160_v22 = vld [vmem:[#allocation7 + $0x198] sm:$0xff]  ;;  %v454_v1 = vld [vmem:[#allocation7 + $0xac8] sm:$0xff] }
  0xd5   :  { %1320 = vmatpush.msra.mxu1 %v280_v9  ;;  %1298 = vmatpush.msra.mxu0 %v178_v6  ;;  %v2126_v49 = vpop.f32.mrf.mxu1  ;;  %v346_v35 = vld [vmem:[#allocation7 + $0x768] sm:$0xff]  ;;  %v424_v43 = vld [vmem:[#allocation7 + $0x9d8] sm:$0xff] }
  0xd6   :  { %1260 = vmatpush.msrb.mxu2 %v513_v7  ;;  %1282 = vmatpush.msrb.mxu3 %v615_v8  ;;  %v208_v7 = vld [vmem:[#allocation7 + $0x318] sm:$0xff]  ;;  %v921_v8 = vadd.f32 %v920_v55, %v898_v59  ;;  %v658_v55 = vld [vmem:[#allocation7 + $0x1128] sm:$0xff] }
  0xd7   :  { %1244 = vmatmul.f32.gmra.mxu1 %v2066_v27  ;;  %1299 = vmatpush.msra.mxu0 %v172_v10  ;;  %v154_v27 = vld [vmem:[#allocation7 + $0x168] sm:$0xff]  ;;  %v448_v10 = vld [vmem:[#allocation7 + $0xa98] sm:$0xff] }
  0xd8   :  { %1321 = vmatpush.msra.mxu1 %v274_v11  ;;  %1261 = vmatpush.msrb.mxu2 %v507_v12  ;;  %v2131_v11 = vld [vmem:[#allocation2] sm:$0xff]  ;;  %v652_v59 = vld [vmem:[#allocation7 + $0x10f8] sm:$0xff] }
  0xd9   :  { %1283 = vmatpush.msrb.mxu3 %v609_v13  ;;  %1300 = vmatpush.msra.mxu0 %v166_v14  ;;  %v900_v6 = vpop.f32.mrf.mxu2  ;;  %v580_v14 = vld [vmem:[#allocation7 + $0xeb8] sm:$0xff] }
  0xda   :  { %1322 = vmatpush.msra.mxu1 %v268_v15  ;;  %1262 = vmatpush.msrb.mxu2 %v501_v16  ;;  %v682_v15 = vld [vmem:[#allocation7 + $0x11e8] sm:$0xff] }
  0xdb   :  { %1284 = vmatpush.msrb.mxu3 %v603_v17  ;;  %1301 = vmatpush.msra.mxu0 %v160_v22  ;;  %v340_v17 = vld [vmem:[#allocation7 + $0x738] sm:$0xff]  ;;  %v442_v22 = vld [vmem:[#allocation7 + $0xa68] sm:$0xff] }
  0xdc   :  { %1323 = vmatpush.msra.mxu1 %v262_v19  ;;  %1263 = vmatpush.msrb.mxu2 %v495_v21  ;;  %v923_v13 = vpop.f32.mrf.mxu3  ;;  %v2134_v19 = vld [vmem:[#allocation2 + $0x8] sm:$0xff]  ;;  %v574_v21 = vld [vmem:[#allocation7 + $0xe88] sm:$0xff] }
  0xdd   :  { %1285 = vmatpush.msrb.mxu3 %v597_v23  ;;  %1264 = vmatmul.f32.vlgmr.msrb.gmra.mxu2 %v2070_v42  ;;  %v2124_v42 = vpop.f32.mrf.mxu0  ;;  %v676_v23 = vld [vmem:[#allocation7 + $0x11b8] sm:$0xff] }
  0xde   :  { %1302 = vmatpush.msra.mxu0 %v154_v27  ;;  %1324 = vmatpush.msra.mxu1 %v256_v24  ;;  %v901_v27 = vadd.f32 %v900_v6, %v2104_v58  ;;  %v334_v24 = vld [vmem:[#allocation7 + $0x708] sm:$0xff] }
  0xdf   :  { %1340 = vmatpush.msra.mxu2 %v394_v32  ;;  %1286 = vmatpush.msrb.mxu3 %v591_v28  ;;  %v966_v16 = vpop.f32.mrf.mxu1  ;;  %v436_v32 = vld [vmem:[#allocation7 + $0xa38] sm:$0xff]  ;;  %v406_v6 = vld [vmem:[#allocation7 + $0x948] sm:$0xff] }
  0xe0   :  { %1303 = vmatpush.msra.mxu0 %v148_v29  ;;  %1287 = vmatmul.f32.vlgmr.msrb.gmra.mxu3 %v2073_v48  ;;  %v232_v48 = vld [vmem:[#allocation7 + $0x3d8] sm:$0xff] }
  0xe1   :  { %1325 = vmatpush.msra.mxu1 %v250_v38  ;;  %1341 = vmatpush.msra.mxu2 %v388_v30  ;;  %v568_v29 = vld [vmem:[#allocation7 + $0xe58] sm:$0xff]  ;;  %v670_v38 = vld [vmem:[#allocation7 + $0x1188] sm:$0xff]  ;;  %v2138_v30 = vld [vmem:[#allocation10] sm:$0x3f] }
  0xe2   :  { %1363 = vmatpush.msra.mxu3 %v490_v31  ;;  %1304 = vmatpush.msra.mxu0 %v142_v33  ;;  %v328_v31 = vld [vmem:[#allocation7 + $0x6d8] sm:$0xff]  ;;  %v430_v33 = vld [vmem:[#allocation7 + $0xa08] sm:$0xff] }
  0xe3   :  { %1326 = vmatpush.msra.mxu1 %v244_v34  ;;  %1342 = vmatpush.msra.mxu2 %v382_v36  ;;  %v664_v36 = vld [vmem:[#allocation7 + $0x1158] sm:$0xff] }
  0xe4   :  { %1364 = vmatpush.msra.mxu3 %v484_v37  ;;  %1305 = vmatpush.msra.mxu0 %v136_v39  ;;  %v924_v39 = vadd.f32 %v923_v13, %v901_v27  ;;  %v532_v13 = vld [vmem:[#allocation7 + $0xd38] sm:$0xff] }
  0xe5   :  { %1327 = vmatpush.msra.mxu1 %v238_v40  ;;  %1343 = vmatpush.msra.mxu2 %v376_v50  ;;  %v943_v9 = vpop.f32.mrf.mxu0  ;;  %v562_v40 = vld [vmem:[#allocation7 + $0xe28] sm:$0xff]  ;;  %v628_v27 = vld [vmem:[#allocation7 + $0x1038] sm:$0xff] }
  0xe6   :  { %1365 = vmatpush.msra.mxu3 %v478_v41  ;;  %1267 = vmatmul.f32.gmra.mxu2 %v2076_v62  ;;  %v112_v62 = vld [vmem:[#allocation7 + $0x18] sm:$0xff]  ;;  %v944_v12 = vadd.f32 %v943_v9, %v921_v8  ;;  %v322_v50 = vld [vmem:[#allocation7 + $0x6a8] sm:$0xff]  ;;  %v1710_v41 = vperm.slane %v2138_v30, 0 }
  0xe7   :  { %1306 = vmatpush.msra.mxu0 %v130_v44  ;;  %1328 = vmatpush.msra.mxu1 %v232_v48  ;;  %v2141_v48 = vld [vmem:[#allocation2 + $0x30] sm:$0xff]  ;;  %v304_v9 = vld [vmem:[#allocation7 + $0x618] sm:$0xff]  ;;  %v538_v8 = vld [vmem:[#allocation7 + $0xd68] sm:$0xff] }
  0xe8   :  { %1344 = vmatpush.msra.mxu2 %v370_v46  ;;  %1366 = vmatpush.msra.mxu3 %v472_v47  ;;  %v967_v28 = vadd.f32 %v966_v16, %v944_v12  ;;  %v556_v47 = vld [vmem:[#allocation7 + $0xdf8] sm:$0xff]  ;;  %v634_v16 = vld [vmem:[#allocation7 + $0x1068] sm:$0xff] }
  0xe9   :  { %1307 = vmatpush.msra.mxu0 %v124_v51  ;;  %1290 = vmatmul.f32.gmra.mxu3 %v2079_v5  ;;  %v586_v5 = vld [vmem:[#allocation7 + $0xee8] sm:$0xff]  ;;  %v400_v12 = vld [vmem:[#allocation7 + $0x918] sm:$0xff] }
  0xea   :  { %1329 = vmatpush.msra.mxu1 %v226_v52  ;;  %1345 = vmatpush.msra.mxu2 %v364_v53  ;;  %v969_v52 = vpop.f32.mrf.mxu1  ;;  %v316_v53 = vld [vmem:[#allocation7 + $0x678] sm:$0xff] }
  0xeb   :  { %1367 = vmatpush.msra.mxu3 %v466_v54  ;;  %1308 = vmatpush.msra.mxu0 %v118_v56  ;;  %v418_v54 = vld [vmem:[#allocation7 + $0x9a8] sm:$0xff] }
  0xec   :  { %1330 = vmatpush.msra.mxu1 %v220_v57  ;;  %1346 = vmatpush.msra.mxu2 %v358_v60  ;;  %v2144_v56 = vld [vmem:[#allocation2 + $0x38] sm:$0xff] }
  0xed   :  { %1368 = vmatpush.msra.mxu3 %v460_v4  ;;  %1309 = vmatpush.msra.mxu0 %v112_v62  ;;  %v946_v58 = vpop.f32.mrf.mxu0  ;;  %v550_v57 = vld [vmem:[#allocation7 + $0xdc8] sm:$0xff]  ;;  %v412_v62 = vld [vmem:[#allocation7 + $0x978] sm:$0xff] }
  0xee   :  { %1331 = vmatpush.msra.mxu1 %v214_v63  ;;  %1347 = vmatpush.msra.mxu2 %v352_v0  ;;  %v947_v46 = vadd.f32 %v946_v58, %v924_v39  ;;  %v310_v4 = vld [vmem:[#allocation7 + $0x648] sm:$0xff]  ;;  %v544_v0 = vld [vmem:[#allocation7 + $0xd98] sm:$0xff]  ;;  %v281_v39 = vld [vmem:[#allocation7 + $0x560] sm:$0xff] }
  0xef   :  { %1369 = vmatpush.msra.mxu3 %v454_v1  ;;  %1310 = vmatmul.f32.vlgmr.msra.gmra.mxu0 %v2131_v11  ;;  %v646_v1 = vld [vmem:[#allocation7 + $0x10c8] sm:$0xff]  ;;  %v616_v58 = vld [vmem:[#allocation7 + $0xfd8] sm:$0xff] }
  0xf0   :  { %1332 = vmatpush.msra.mxu1 %v208_v7  ;;  %1386 = vmatpush.msrb.mxu0 %v586_v5  ;;  %v970_v63 = vadd.f32 %v969_v52, %v947_v46  ;;  %v502_v46 = vld [vmem:[#allocation7 + $0xc48] sm:$0xff]  ;;  %v269_v52 = vld [vmem:[#allocation7 + $0x500] sm:$0xff] }
  0xf1   :  { %1348 = vmatpush.msra.mxu2 %v346_v35  ;;  %1370 = vmatpush.msra.mxu3 %v448_v10  ;;  %v640_v35 = vld [vmem:[#allocation7 + $0x1098] sm:$0xff]  ;;  %v203_v10 = vld [vmem:[#allocation7 + $0x2f0] sm:$0xff] }
  0xf2   :  { %1333 = vmatmul.f32.vlgmr.msra.gmra.mxu1 %v2134_v19  ;;  %1387 = vmatpush.msrb.mxu0 %v580_v14 }
  0xf3   :  { %1409 = vmatpush.msrb.mxu1 %v682_v15  ;;  %1349 = vmatpush.msra.mxu2 %v340_v17  ;;  %v2149_v15 = vld [vmem:[#allocation2 + $0x10] sm:$0xff] }
  0xf4   :  { %1371 = vmatpush.msra.mxu3 %v442_v22  ;;  %1388 = vmatpush.msrb.mxu0 %v574_v21  ;;  %v989_v34 = vpop.f32.mrf.mxu2  ;;  %v197_v22 = vld [vmem:[#allocation7 + $0x2c0] sm:$0xff]  ;;  %v299_v21 = vld [vmem:[#allocation7 + $0x5f0] sm:$0xff] }
  0xf5   :  { %1410 = vmatpush.msrb.mxu1 %v676_v23  ;;  %1350 = vmatpush.msra.mxu2 %v334_v24  ;;  %v990_v37 = vadd.f32 %v989_v34, %v967_v28  ;;  %v526_v23 = vld [vmem:[#allocation7 + $0xd08] sm:$0xff]  ;;  %v191_v28 = vld [vmem:[#allocation7 + $0x290] sm:$0xff] }
  0xf6   :  { %1372 = vmatpush.msra.mxu3 %v436_v32  ;;  %1389 = vmatpush.msrb.mxu0 %v568_v29  ;;  %v2154_v32 = vld [vmem:[#allocation2 + $0x18] sm:$0xff]  ;;  %v293_v29 = vld [vmem:[#allocation7 + $0x5c0] sm:$0xff]  ;;  %v287_v34 = vld [vmem:[#allocation7 + $0x590] sm:$0xff] }
  0xf7   :  { %1411 = vmatpush.msrb.mxu1 %v670_v38  ;;  %1351 = vmatpush.msra.mxu2 %v328_v31  ;;  %v1012_v44 = vpop.f32.mrf.mxu3  ;;  %v520_v38 = vld [vmem:[#allocation7 + $0xcd8] sm:$0xff]  ;;  %v622_v31 = vld [vmem:[#allocation7 + $0x1008] sm:$0xff] }
  0xf8   :  { %1373 = vmatpush.msra.mxu3 %v430_v33  ;;  %1313 = vmatmul.f32.gmra.mxu0 %v2141_v48  ;;  %v1013_v51 = vadd.f32 %v1012_v44, %v990_v37  ;;  %v185_v33 = vld [vmem:[#allocation7 + $0x260] sm:$0xff]  ;;  %v179_v37 = vld [vmem:[#allocation7 + $0x230] sm:$0xff] }
  0xf9   :  { %1412 = vmatpush.msrb.mxu1 %v664_v36  ;;  %1390 = vmatpush.msrb.mxu0 %v562_v40  ;;  %v514_v36 = vld [vmem:[#allocation7 + $0xca8] sm:$0xff]  ;;  %v508_v40 = vld [vmem:[#allocation7 + $0xc78] sm:$0xff]  ;;  %v275_v44 = vld [vmem:[#allocation7 + $0x530] sm:$0xff] }
  0xfa   :  { %1352 = vmatpush.msra.mxu2 %v322_v50  ;;  %1374 = vmatpush.msra.mxu3 %v424_v43  ;;  %v1722_v60 = vadd.f32 %v1710_v41, %v1013_v51  ;;  %v2157_v50 = vld [vmem:[#allocation2 + $0x40] sm:$0xff]  ;;  %v173_v43 = vld [vmem:[#allocation7 + $0x200] sm:$0xff] }
  0xfb   :  { %1336 = vmatmul.f32.gmra.mxu1 %v2144_v56  ;;  %1391 = vmatpush.msrb.mxu0 %v556_v47  ;;  %v604_v47 = vld [vmem:[#allocation7 + $0xf78] sm:$0xff]  ;;  %v167_v51 = vld [vmem:[#allocation7 + $0x1d0] sm:$0xff] }
  0xfc   :  { %1413 = vmatpush.msrb.mxu1 %v658_v55  ;;  %1353 = vmatpush.msra.mxu2 %v316_v53  ;;  %1734 = vst [vmem:[#allocation11] sm:$0xff] %v1722_v60  ;;  %v2160_v55 = vld [vmem:[#allocation2 + $0x48] sm:$0xff] }
  0xfd   :  { %1375 = vmatpush.msra.mxu3 %v418_v54  ;;  %1392 = vmatpush.msrb.mxu0 %v550_v57  ;;  %v992_v7 = vpop.f32.mrf.mxu2  ;;  %v496_v53 = vld [vmem:[#allocation7 + $0xc18] sm:$0xff]  ;;  %v598_v54 = vld [vmem:[#allocation7 + $0xf48] sm:$0xff]  ;;  %v161_v57 = vld [vmem:[#allocation7 + $0x1a0] sm:$0xff] }
  0xfe   :  { %1414 = vmatpush.msrb.mxu1 %v652_v59  ;;  %1354 = vmatpush.msra.mxu2 %v310_v4  ;;  %v993_v5 = vadd.f32 %v992_v7, %v970_v63  ;;  %v263_v59 = vld [vmem:[#allocation7 + $0x4d0] sm:$0xff]  ;;  %v592_v60 = vld [vmem:[#allocation7 + $0xf18] sm:$0xff] }
  0xff   :  { %1376 = vmatpush.msra.mxu3 %v412_v62  ;;  %1393 = vmatpush.msrb.mxu0 %v544_v0  ;;  %v395_v4 = vld [vmem:[#allocation7 + $0x8f0] sm:$0xff]  ;;  %v257_v0 = vld [vmem:[#allocation7 + $0x4a0] sm:$0xff] }
 0x100   :  { %1415 = vmatpush.msrb.mxu1 %v646_v1  ;;  %1355 = vmatpush.msra.mxu2 %v304_v9  ;;  %v1015_v14 = vpop.f32.mrf.mxu3  ;;  %v155_v62 = vld [vmem:[#allocation7 + $0x170] sm:$0xff]  ;;  %v1035_v63 = vpop.f32.mrf.mxu0  ;;  %v389_v9 = vld [vmem:[#allocation7 + $0x8c0] sm:$0xff] }
 0x101   :  { %1377 = vmatpush.msra.mxu3 %v406_v6  ;;  %1356 = vmatmul.f32.vlgmr.msra.gmra.mxu2 %v2149_v15  ;;  %v1016_v17 = vadd.f32 %v1015_v14, %v993_v5  ;;  %v2163_v1 = vld [vmem:[#allocation2 + $0x20] sm:$0xff]  ;;  %v245_v14 = vld [vmem:[#allocation7 + $0x440] sm:$0xff] }
 0x102   :  { %1394 = vmatpush.msrb.mxu0 %v538_v8  ;;  %1416 = vmatpush.msrb.mxu1 %v640_v35  ;;  %v491_v6 = vld [vmem:[#allocation7 + $0xbf0] sm:$0xff]  ;;  %v149_v8 = vld [vmem:[#allocation7 + $0x140] sm:$0xff]  ;;  %v2166_v35 = vld [vmem:[#allocation2 + $0x28] sm:$0xff] }
 0x103   :  { %1432 = vmatpush.msrb.mxu2 %v203_v10  ;;  %1378 = vmatpush.msra.mxu3 %v400_v12  ;;  %v1728_v24 = vadd.f32 %v1710_v41, %v1016_v17  ;;  %v610_v41 = vld [vmem:[#allocation7 + $0xfa8] sm:$0xff]  ;;  %v1058_v7 = vpop.f32.mrf.mxu1  ;;  %v251_v5 = vld [vmem:[#allocation7 + $0x470] sm:$0xff]  ;;  %v485_v12 = vld [vmem:[#allocation7 + $0xbc0] sm:$0xff] }
 0x104   :  { %1395 = vmatpush.msrb.mxu0 %v532_v13  ;;  %1379 = vmatmul.f32.vlgmr.msra.gmra.mxu3 %v2154_v32  ;;  %v383_v10 = vld [vmem:[#allocation7 + $0x890] sm:$0xff] }
 0x105   :  { %1417 = vmatpush.msrb.mxu1 %v634_v16  ;;  %1433 = vmatpush.msrb.mxu2 %v197_v22  ;;  %1740 = vst [vmem:[#allocation11 + $0x30] sm:$0xff] %v1728_v24  ;;  %v143_v13 = vld [vmem:[#allocation7 + $0x110] sm:$0xff]  ;;  %v377_v16 = vld [vmem:[#allocation7 + $0x860] sm:$0xff] }
 0x106   :  { %1455 = vmatpush.msrb.mxu3 %v299_v21  ;;  %1396 = vmatpush.msrb.mxu0 %v526_v23  ;;  %v479_v17 = vld [vmem:[#allocation7 + $0xb90] sm:$0xff]  ;;  %v137_v22 = vld [vmem:[#allocation7 + $0xe0] sm:$0xff]  ;;  %v1036_v23 = vadd.f32 %v1035_v63, %v2100_v45 }
 0x107   :  { %1418 = vmatpush.msrb.mxu1 %v628_v27  ;;  %1434 = vmatpush.msrb.mxu2 %v191_v28  ;;  %v239_v21 = vld [vmem:[#allocation7 + $0x410] sm:$0xff]  ;;  %v473_v27 = vld [vmem:[#allocation7 + $0xb60] sm:$0xff] }
 0x108   :  { %1456 = vmatpush.msrb.mxu3 %v293_v29  ;;  %1397 = vmatpush.msrb.mxu0 %v520_v38  ;;  %v371_v24 = vld [vmem:[#allocation7 + $0x830] sm:$0xff]  ;;  %v233_v29 = vld [vmem:[#allocation7 + $0x3e0] sm:$0xff]  ;;  %v1059_v45 = vadd.f32 %v1058_v7, %v1036_v23 }
 0x109   :  { %1419 = vmatpush.msrb.mxu1 %v622_v31  ;;  %1435 = vmatpush.msrb.mxu2 %v185_v33  ;;  %v131_v28 = vld [vmem:[#allocation7 + $0xb0] sm:$0xff]  ;;  %v2170_v31 = vld [vmem:[#allocation2 + $0x50] sm:$0xff]  ;;  %v1038_v33 = vpop.f32.mrf.mxu0 }
 0x10a   :  { %1457 = vmatpush.msrb.mxu3 %v287_v34  ;;  %1359 = vmatmul.f32.gmra.mxu2 %v2157_v50  ;;  %v365_v34 = vld [vmem:[#allocation7 + $0x800] sm:$0xff]  ;;  %v443_v7 = vld [vmem:[#allocation7 + $0xa70] sm:$0xff] }
 0x10b   :  { %1398 = vmatpush.msrb.mxu0 %v514_v36  ;;  %1420 = vmatpush.msrb.mxu1 %v616_v58  ;;  %v467_v36 = vld [vmem:[#allocation7 + $0xb30] sm:$0xff]  ;;  %v125_v58 = vld [vmem:[#allocation7 + $0x80] sm:$0xff] }
 0x10c   :  { %1436 = vmatpush.msrb.mxu2 %v179_v37  ;;  %1458 = vmatpush.msrb.mxu3 %v281_v39  ;;  %v227_v37 = vld [vmem:[#allocation7 + $0x3b0] sm:$0xff]  ;;  %v2173_v39 = vld [vmem:[#allocation2 + $0x58] sm:$0xff]  ;;  %v677_v23 = vld [vmem:[#allocation7 + $0x11c0] sm:$0xff] }
 0x10d   :  { %1399 = vmatpush.msrb.mxu0 %v508_v40  ;;  %1382 = vmatmul.f32.gmra.mxu3 %v2160_v55  ;;  %v1061_v40 = vpop.f32.mrf.mxu1 }
 0x10e   :  { %1421 = vmatpush.msrb.mxu1 %v610_v41  ;;  %1437 = vmatpush.msrb.mxu2 %v173_v43  ;;  %v359_v41 = vld [vmem:[#allocation7 + $0x7d0] sm:$0xff]  ;;  %v461_v43 = vld [vmem:[#allocation7 + $0xb00] sm:$0xff] }
 0x10f   :  { %1459 = vmatpush.msrb.mxu3 %v275_v44  ;;  %1400 = vmatpush.msrb.mxu0 %v502_v46  ;;  %v119_v44 = vld [vmem:[#allocation7 + $0x50] sm:$0xff]  ;;  %v221_v46 = vld [vmem:[#allocation7 + $0x380] sm:$0xff] }
 0x110   :  { %1422 = vmatpush.msrb.mxu1 %v604_v47  ;;  %1438 = vmatpush.msrb.mxu2 %v167_v51 }
 0x111   :  { %1460 = vmatpush.msrb.mxu3 %v269_v52  ;;  %1401 = vmatpush.msrb.mxu0 %v496_v53  ;;  %v353_v52 = vld [vmem:[#allocation7 + $0x7a0] sm:$0xff]  ;;  %v455_v53 = vld [vmem:[#allocation7 + $0xad0] sm:$0xff] }
 0x112   :  { %1423 = vmatpush.msrb.mxu1 %v598_v54  ;;  %1439 = vmatpush.msrb.mxu2 %v161_v57  ;;  %v113_v54 = vld [vmem:[#allocation7 + $0x20] sm:$0xff]  ;;  %v215_v57 = vld [vmem:[#allocation7 + $0x350] sm:$0xff] }
 0x113   :  { %1461 = vmatpush.msrb.mxu3 %v263_v59  ;;  %1402 = vmatmul.f32.vlgmr.msrb.gmra.mxu0 %v2163_v1  ;;  %v1039_v59 = vadd.f32 %v1038_v33, %v2110_v3  ;;  %v1711_v3 = vperm.slane %v2138_v30, 1  ;;  %v569_v33 = vld [vmem:[#allocation7 + $0xe60] sm:$0xff] }
 0x114   :  { %1424 = vmatpush.msrb.mxu1 %v592_v60  ;;  %1478 = vmatpush.msra.mxu0 %v395_v4  ;;  %v347_v60 = vld [vmem:[#allocation7 + $0x770] sm:$0xff]  ;;  %v449_v4 = vld [vmem:[#allocation7 + $0xaa0] sm:$0xff] }
 0x115   :  { %1440 = vmatpush.msrb.mxu2 %v155_v62  ;;  %1462 = vmatpush.msrb.mxu3 %v257_v0  ;;  %v587_v62 = vld [vmem:[#allocation7 + $0xef0] sm:$0xff]  ;;  %v209_v0 = vld [vmem:[#allocation7 + $0x320] sm:$0xff] }
 0x116   :  { %1425 = vmatmul.f32.vlgmr.msrb.gmra.mxu1 %v2166_v35  ;;  %1479 = vmatpush.msra.mxu0 %v389_v9  ;;  %v341_v9 = vld [vmem:[#allocation7 + $0x740] sm:$0xff] }
 0x117   :  { %1501 = vmatpush.msra.mxu1 %v491_v6  ;;  %1441 = vmatpush.msrb.mxu2 %v149_v8 }
 0x118   :  { %1463 = vmatpush.msrb.mxu3 %v251_v5  ;;  %1480 = vmatpush.msra.mxu0 %v383_v10  ;;  %v1081_v38 = vpop.f32.mrf.mxu2  ;;  %v1062_v10 = vadd.f32 %v1061_v40, %v1039_v59  ;;  %v665_v40 = vld [vmem:[#allocation7 + $0x1160] sm:$0xff]  ;;  %v551_v59 = vld [vmem:[#allocation7 + $0xdd0] sm:$0xff] }
 0x119   :  { %1502 = vmatpush.msra.mxu1 %v485_v12  ;;  %1442 = vmatpush.msrb.mxu2 %v143_v13  ;;  %v1082_v47 = vadd.f32 %v1081_v38, %v1059_v45  ;;  %v581_v12 = vld [vmem:[#allocation7 + $0xec0] sm:$0xff]  ;;  %v683_v13 = vld [vmem:[#allocation7 + $0x11f0] sm:$0xff] }
 0x11a   :  { %1464 = vmatpush.msrb.mxu3 %v245_v14  ;;  %1481 = vmatpush.msra.mxu0 %v377_v16  ;;  %v335_v16 = vld [vmem:[#allocation7 + $0x710] sm:$0xff]  ;;  %v425_v45 = vld [vmem:[#allocation7 + $0x9e0] sm:$0xff] }
 0x11b   :  { %1503 = vmatpush.msra.mxu1 %v479_v17  ;;  %1443 = vmatpush.msrb.mxu2 %v137_v22  ;;  %v1104_v51 = vpop.f32.mrf.mxu3  ;;  %v437_v17 = vld [vmem:[#allocation7 + $0xa40] sm:$0xff] }
 0x11c   :  { %1465 = vmatpush.msrb.mxu3 %v239_v21  ;;  %1405 = vmatmul.f32.gmra.mxu0 %v2170_v31  ;;  %v1105_v63 = vadd.f32 %v1104_v51, %v1082_v47  ;;  %v575_v21 = vld [vmem:[#allocation7 + $0xe90] sm:$0xff]  ;;  %v557_v47 = vld [vmem:[#allocation7 + $0xe00] sm:$0xff] }
 0x11d   :  { %1504 = vmatpush.msra.mxu1 %v473_v27  ;;  %1482 = vmatpush.msra.mxu0 %v371_v24  ;;  %v329_v24 = vld [vmem:[#allocation7 + $0x6e0] sm:$0xff]  ;;  %v659_v51 = vld [vmem:[#allocation7 + $0x1130] sm:$0xff] }
 0x11e   :  { %1444 = vmatpush.msrb.mxu2 %v131_v28  ;;  %1466 = vmatpush.msrb.mxu3 %v233_v29  ;;  %v431_v28 = vld [vmem:[#allocation7 + $0xa10] sm:$0xff] }
 0x11f   :  { %1428 = vmatmul.f32.gmra.mxu1 %v2173_v39  ;;  %1483 = vmatpush.msra.mxu0 %v365_v34  ;;  %v671_v34 = vld [vmem:[#allocation7 + $0x1190] sm:$0xff] }
 0x120   :  { %1505 = vmatpush.msra.mxu1 %v467_v36  ;;  %1445 = vmatpush.msrb.mxu2 %v125_v58  ;;  %v323_v36 = vld [vmem:[#allocation7 + $0x6b0] sm:$0xff] }
 0x121   :  { %1467 = vmatpush.msrb.mxu3 %v227_v37  ;;  %1484 = vmatpush.msra.mxu0 %v359_v41  ;;  %v1084_v8 = vpop.f32.mrf.mxu2  ;;  %v563_v58 = vld [vmem:[#allocation7 + $0xe30] sm:$0xff]  ;;  %v317_v41 = vld [vmem:[#allocation7 + $0x680] sm:$0xff] }
 0x122   :  { %1506 = vmatpush.msra.mxu1 %v461_v43  ;;  %1446 = vmatpush.msrb.mxu2 %v119_v44  ;;  %v1085_v27 = vadd.f32 %v1084_v8, %v1062_v10  ;;  %v419_v44 = vld [vmem:[#allocation7 + $0x9b0] sm:$0xff]  ;;  %v198_v10 = vld [vmem:[#allocation7 + $0x2c8] sm:$0xff] }
 0x123   :  { %1468 = vmatpush.msrb.mxu3 %v221_v46  ;;  %1485 = vmatpush.msra.mxu0 %v353_v52  ;;  %v539_v8 = vld [vmem:[#allocation7 + $0xd70] sm:$0xff] }
 0x124   :  { %1507 = vmatpush.msra.mxu1 %v455_v53  ;;  %1447 = vmatpush.msrb.mxu2 %v113_v54  ;;  %v1127_v6 = vpop.f32.mrf.mxu0  ;;  %v1107_v29 = vpop.f32.mrf.mxu3  ;;  %v311_v53 = vld [vmem:[#allocation7 + $0x650] sm:$0xff]  ;;  %v413_v54 = vld [vmem:[#allocation7 + $0x980] sm:$0xff] }
 0x125   :  { %1469 = vmatpush.msrb.mxu3 %v215_v57  ;;  %1448 = vmatmul.f32.vlgmr.msrb.gmra.mxu2 %v2131_v11  ;;  %v1128_v5 = vadd.f32 %v1127_v6, %v1105_v63  ;;  %v1108_v37 = vadd.f32 %v1107_v29, %v1085_v27  ;;  %v401_v6 = vld [vmem:[#allocation7 + $0x920] sm:$0xff]  ;;  %v180_v29 = vld [vmem:[#allocation7 + $0x238] sm:$0xff] }
 0x126   :  { %1486 = vmatpush.msra.mxu0 %v347_v60  ;;  %1508 = vmatpush.msra.mxu1 %v449_v4  ;;  %v653_v60 = vld [vmem:[#allocation7 + $0x1100] sm:$0xff] }
 0x127   :  { %1524 = vmatpush.msra.mxu2 %v587_v62  ;;  %v1150_v14 = vpop.f32.mrf.mxu1  ;;  %1470 = vmatpush.msrb.mxu3 %v209_v0  ;;  %v305_v4 = vld [vmem:[#allocation7 + $0x620] sm:$0xff]  ;;  %v407_v62 = vld [vmem:[#allocation7 + $0x950] sm:$0xff] }
 0x128   :  { %1487 = vmatpush.msra.mxu0 %v341_v9  ;;  %v1151_v22 = vadd.f32 %v1150_v14, %v1128_v5  ;;  %1471 = vmatmul.f32.vlgmr.msrb.gmra.mxu3 %v2134_v19  ;;  %v545_v0 = vld [vmem:[#allocation7 + $0xda0] sm:$0xff]  ;;  %v647_v9 = vld [vmem:[#allocation7 + $0x10d0] sm:$0xff]  ;;  %v192_v14 = vld [vmem:[#allocation7 + $0x298] sm:$0xff] }
 0x129   :  { %1509 = vmatpush.msra.mxu1 %v443_v7  ;;  %1525 = vmatpush.msra.mxu2 %v581_v12  ;;  %v204_v7 = vld [vmem:[#allocation7 + $0x2f8] sm:$0xff]  ;;  %v641_v5 = vld [vmem:[#allocation7 + $0x10a0] sm:$0xff] }
 0x12a   :  { %1547 = vmatpush.msra.mxu3 %v683_v13  ;;  %v1723_v38 = vadd.f32 %v1711_v3, %v1151_v22  ;;  %1488 = vmatpush.msra.mxu0 %v335_v16  ;;  %v533_v12 = vld [vmem:[#allocation7 + $0xd40] sm:$0xff]  ;;  %v635_v13 = vld [vmem:[#allocation7 + $0x1070] sm:$0xff]  ;;  %v294_v16 = vld [vmem:[#allocation7 + $0x5c8] sm:$0xff] }
 0x12b   :  { %1510 = vmatpush.msra.mxu1 %v437_v17  ;;  %1526 = vmatpush.msra.mxu2 %v575_v21  ;;  %v527_v17 = vld [vmem:[#allocation7 + $0xd10] sm:$0xff]  ;;  %v629_v22 = vld [vmem:[#allocation7 + $0x1040] sm:$0xff]  ;;  %v186_v21 = vld [vmem:[#allocation7 + $0x268] sm:$0xff] }
 0x12c   :  { %1548 = vmatpush.msra.mxu3 %v677_v23  ;;  %1735 = vst [vmem:[#allocation11 + $0x8] sm:$0xff] %v1723_v38  ;;  %1489 = vmatpush.msra.mxu0 %v329_v24  ;;  %v288_v23 = vld [vmem:[#allocation7 + $0x598] sm:$0xff]  ;;  %v521_v27 = vld [vmem:[#allocation7 + $0xce0] sm:$0xff]  ;;  %v623_v24 = vld [vmem:[#allocation7 + $0x1010] sm:$0xff] }
 0x12d   :  { %1511 = vmatpush.msra.mxu1 %v431_v28  ;;  %1527 = vmatpush.msra.mxu2 %v569_v33  ;;  %v1130_v43 = vpop.f32.mrf.mxu0  ;;  %v282_v28 = vld [vmem:[#allocation7 + $0x568] sm:$0xff]  ;;  %v515_v38 = vld [vmem:[#allocation7 + $0xcb0] sm:$0xff]  ;;  %v617_v33 = vld [vmem:[#allocation7 + $0xfe0] sm:$0xff] }
 0x12e   :  { %1549 = vmatpush.msra.mxu3 %v671_v34  ;;  %1451 = vmatmul.f32.gmra.mxu2 %v2141_v48  ;;  %v1131_v46 = vadd.f32 %v1130_v43, %v1108_v37  ;;  %v174_v34 = vld [vmem:[#allocation7 + $0x208] sm:$0xff]  ;;  %v168_v37 = vld [vmem:[#allocation7 + $0x1d8] sm:$0xff]  ;;  %v605_v43 = vld [vmem:[#allocation7 + $0xf80] sm:$0xff] }
 0x12f   :  { %1490 = vmatpush.msra.mxu0 %v323_v36  ;;  %1512 = vmatpush.msra.mxu1 %v425_v45  ;;  %v276_v36 = vld [vmem:[#allocation7 + $0x538] sm:$0xff]  ;;  %v509_v45 = vld [vmem:[#allocation7 + $0xc80] sm:$0xff] }
 0x130   :  { %1528 = vmatpush.msra.mxu2 %v563_v58  ;;  %v1153_v52 = vpop.f32.mrf.mxu1  ;;  %1550 = vmatpush.msra.mxu3 %v665_v40  ;;  %v611_v58 = vld [vmem:[#allocation7 + $0xfb0] sm:$0xff]  ;;  %v270_v40 = vld [vmem:[#allocation7 + $0x508] sm:$0xff] }
 0x131   :  { %1491 = vmatpush.msra.mxu0 %v317_v41  ;;  %v1154_v57 = vadd.f32 %v1153_v52, %v1131_v46  ;;  %1474 = vmatmul.f32.gmra.mxu3 %v2144_v56  ;;  %v503_v41 = vld [vmem:[#allocation7 + $0xc50] sm:$0xff]  ;;  %v264_v46 = vld [vmem:[#allocation7 + $0x4d8] sm:$0xff] }
 0x132   :  { %1513 = vmatpush.msra.mxu1 %v419_v44  ;;  %1529 = vmatpush.msra.mxu2 %v557_v47  ;;  %v162_v44 = vld [vmem:[#allocation7 + $0x1a8] sm:$0xff]  ;;  %v497_v47 = vld [vmem:[#allocation7 + $0xc20] sm:$0xff]  ;;  %v156_v52 = vld [vmem:[#allocation7 + $0x178] sm:$0xff] }
 0x133   :  { %1551 = vmatpush.msra.mxu3 %v659_v51  ;;  %v1729_v63 = vadd.f32 %v1711_v3, %v1154_v57  ;;  %1492 = vmatpush.msra.mxu0 %v311_v53  ;;  %v300_v3 = vld [vmem:[#allocation7 + $0x5f8] sm:$0xff]  ;;  %v599_v51 = vld [vmem:[#allocation7 + $0xf50] sm:$0xff]  ;;  %v258_v53 = vld [vmem:[#allocation7 + $0x4a8] sm:$0xff] }
 0x134   :  { %1514 = vmatpush.msra.mxu1 %v413_v54  ;;  %1530 = vmatpush.msra.mxu2 %v551_v59  ;;  %v396_v54 = vld [vmem:[#allocation7 + $0x8f8] sm:$0xff]  ;;  %v593_v57 = vld [vmem:[#allocation7 + $0xf20] sm:$0xff]  ;;  %v150_v59 = vld [vmem:[#allocation7 + $0x148] sm:$0xff] }
 0x135   :  { %1552 = vmatpush.msra.mxu3 %v653_v60  ;;  %1741 = vst [vmem:[#allocation11 + $0x38] sm:$0xff] %v1729_v63  ;;  %1493 = vmatpush.msra.mxu0 %v305_v4  ;;  %v252_v60 = vld [vmem:[#allocation7 + $0x478] sm:$0xff]  ;;  %v390_v4 = vld [vmem:[#allocation7 + $0x8c8] sm:$0xff] }
 0x136   :  { %1515 = vmatpush.msra.mxu1 %v407_v62  ;;  %1531 = vmatpush.msra.mxu2 %v545_v0  ;;  %v492_v62 = vld [vmem:[#allocation7 + $0xbf8] sm:$0xff]  ;;  %v246_v0 = vld [vmem:[#allocation7 + $0x448] sm:$0xff] }
 0x137   :  { %1553 = vmatpush.msra.mxu3 %v647_v9  ;;  %1494 = vmatmul.f32.vlgmr.msra.gmra.mxu0 %v2149_v15  ;;  %v144_v63 = vld [vmem:[#allocation7 + $0x118] sm:$0xff] }
 0x138   :  { %1516 = vmatpush.msra.mxu1 %v401_v6  ;;  %1570 = vmatpush.msrb.mxu0 %v204_v7  ;;  %v384_v9 = vld [vmem:[#allocation7 + $0x898] sm:$0xff]  ;;  %v486_v6 = vld [vmem:[#allocation7 + $0xbc8] sm:$0xff] }
 0x139   :  { %1532 = vmatpush.msra.mxu2 %v539_v8  ;;  %1554 = vmatpush.msra.mxu3 %v641_v5  ;;  %v138_v7 = vld [vmem:[#allocation7 + $0xe8] sm:$0xff]  ;;  %v240_v8 = vld [vmem:[#allocation7 + $0x418] sm:$0xff] }
 0x13a   :  { %1517 = vmatmul.f32.vlgmr.msra.gmra.mxu1 %v2154_v32  ;;  %1571 = vmatpush.msrb.mxu0 %v198_v10  ;;  %v378_v5 = vld [vmem:[#allocation7 + $0x868] sm:$0xff]  ;;  %v480_v10 = vld [vmem:[#allocation7 + $0xb98] sm:$0xff] }
 0x13b   :  { %1593 = vmatpush.msrb.mxu1 %v300_v3  ;;  %1533 = vmatpush.msra.mxu2 %v533_v12  ;;  %v132_v12 = vld [vmem:[#allocation7 + $0xb8] sm:$0xff] }
 0x13c   :  { %1555 = vmatpush.msra.mxu3 %v635_v13  ;;  %1572 = vmatpush.msrb.mxu0 %v192_v14  ;;  %v1173_v3 = vpop.f32.mrf.mxu2  ;;  %v234_v13 = vld [vmem:[#allocation7 + $0x3e8] sm:$0xff]  ;;  %v372_v14 = vld [vmem:[#allocation7 + $0x838] sm:$0xff] }
 0x13d   :  { %1594 = vmatpush.msrb.mxu1 %v294_v16  ;;  %1534 = vmatpush.msra.mxu2 %v527_v17  ;;  %v474_v16 = vld [vmem:[#allocation7 + $0xb68] sm:$0xff] }
 0x13e   :  { %1556 = vmatpush.msra.mxu3 %v629_v22  ;;  %1573 = vmatpush.msrb.mxu0 %v186_v21  ;;  %v126_v22 = vld [vmem:[#allocation7 + $0x88] sm:$0xff]  ;;  %v228_v21 = vld [vmem:[#allocation7 + $0x3b8] sm:$0xff] }
 0x13f   :  { %1595 = vmatpush.msrb.mxu1 %v288_v23  ;;  %1535 = vmatpush.msra.mxu2 %v521_v27  ;;  %v1196_v17 = vpop.f32.mrf.mxu3  ;;  %v366_v23 = vld [vmem:[#allocation7 + $0x808] sm:$0xff]  ;;  %v468_v27 = vld [vmem:[#allocation7 + $0xb38] sm:$0xff] }
 0x140   :  { %1557 = vmatpush.msra.mxu3 %v623_v24  ;;  %1497 = vmatmul.f32.gmra.mxu0 %v2157_v50  ;;  %v120_v24 = vld [vmem:[#allocation7 + $0x58] sm:$0xff] }
 0x141   :  { %1596 = vmatpush.msrb.mxu1 %v282_v28  ;;  %1574 = vmatpush.msrb.mxu0 %v180_v29  ;;  %v222_v28 = vld [vmem:[#allocation7 + $0x388] sm:$0xff]  ;;  %v1174_v29 = vadd.f32 %v1173_v3, %v2106_v61  ;;  %v588_v61 = vld [vmem:[#allocation7 + $0xef8] sm:$0xff] }
 0x142   :  { %1536 = vmatpush.msra.mxu2 %v515_v38  ;;  %1558 = vmatpush.msra.mxu3 %v617_v33  ;;  %v360_v38 = vld [vmem:[#allocation7 + $0x7d8] sm:$0xff]  ;;  %v462_v33 = vld [vmem:[#allocation7 + $0xb08] sm:$0xff] }
 0x143   :  { %1520 = vmatmul.f32.gmra.mxu1 %v2160_v55  ;;  %1575 = vmatpush.msrb.mxu0 %v174_v34  ;;  %v114_v34 = vld [vmem:[#allocation7 + $0x28] sm:$0xff] }
 0x144   :  { %1597 = vmatpush.msrb.mxu1 %v276_v36  ;;  %1537 = vmatpush.msra.mxu2 %v509_v45  ;;  %v216_v36 = vld [vmem:[#allocation7 + $0x358] sm:$0xff]  ;;  %v354_v45 = vld [vmem:[#allocation7 + $0x7a8] sm:$0xff] }
 0x145   :  { %1559 = vmatpush.msra.mxu3 %v611_v58  ;;  %1576 = vmatpush.msrb.mxu0 %v168_v37  ;;  %v456_v58 = vld [vmem:[#allocation7 + $0xad8] sm:$0xff] }
 0x146   :  { %1598 = vmatpush.msrb.mxu1 %v270_v40  ;;  %1538 = vmatpush.msra.mxu2 %v503_v41  ;;  %v1176_v40 = vpop.f32.mrf.mxu2  ;;  %v210_v41 = vld [vmem:[#allocation7 + $0x328] sm:$0xff] }
 0x147   :  { %1560 = vmatpush.msra.mxu3 %v605_v43  ;;  %1577 = vmatpush.msrb.mxu0 %v162_v44  ;;  %v1197_v43 = vadd.f32 %v1196_v17, %v1174_v29  ;;  %v348_v44 = vld [vmem:[#allocation7 + $0x778] sm:$0xff] }
 0x148   :  { %1599 = vmatpush.msrb.mxu1 %v264_v46  ;;  %1539 = vmatpush.msra.mxu2 %v497_v47  ;;  %v1219_v37 = vpop.f32.mrf.mxu0  ;;  %v450_v46 = vld [vmem:[#allocation7 + $0xaa8] sm:$0xff]  ;;  %v420_v29 = vld [vmem:[#allocation7 + $0x9b8] sm:$0xff] }
 0x149   :  { %1561 = vmatpush.msra.mxu3 %v599_v51  ;;  %1540 = vmatmul.f32.vlgmr.msra.gmra.mxu2 %v2163_v1  ;;  %v1220_v47 = vadd.f32 %v1219_v37, %v1197_v43  ;;  %v1199_v51 = vpop.f32.mrf.mxu3  ;;  %v306_v37 = vld [vmem:[#allocation7 + $0x628] sm:$0xff] }
 0x14a   :  { %1578 = vmatpush.msrb.mxu0 %v156_v52  ;;  %1600 = vmatpush.msrb.mxu1 %v258_v53  ;;  %v582_v52 = vld [vmem:[#allocation7 + $0xec8] sm:$0xff]  ;;  %v684_v53 = vld [vmem:[#allocation7 + $0x11f8] sm:$0xff] }
 0x14b   :  { %1616 = vmatpush.msrb.mxu2 %v396_v54  ;;  %1562 = vmatpush.msra.mxu3 %v593_v57  ;;  %v1242_v54 = vpop.f32.mrf.mxu1  ;;  %v342_v57 = vld [vmem:[#allocation7 + $0x748] sm:$0xff] }
 0x14c   :  { %1579 = vmatpush.msrb.mxu0 %v150_v59  ;;  %1563 = vmatmul.f32.vlgmr.msra.gmra.mxu3 %v2166_v35  ;;  %v444_v59 = vld [vmem:[#allocation7 + $0xa78] sm:$0xff] }
 0x14d   :  { %1601 = vmatpush.msrb.mxu1 %v252_v60  ;;  %1617 = vmatpush.msrb.mxu2 %v390_v4  ;;  %v576_v60 = vld [vmem:[#allocation7 + $0xe98] sm:$0xff]  ;;  %v678_v4 = vld [vmem:[#allocation7 + $0x11c8] sm:$0xff] }
 0x14e   :  { %1639 = vmatpush.msrb.mxu3 %v492_v62  ;;  %1580 = vmatpush.msrb.mxu0 %v144_v63  ;;  %v1177_v62 = vadd.f32 %v1176_v40, %v2116_v20  ;;  %v438_v63 = vld [vmem:[#allocation7 + $0xa48] sm:$0xff]  ;;  %v408_v40 = vld [vmem:[#allocation7 + $0x958] sm:$0xff] }
 0x14f   :  { %1602 = vmatpush.msrb.mxu1 %v246_v0  ;;  %1618 = vmatpush.msrb.mxu2 %v384_v9  ;;  %v1243_v0 = vadd.f32 %v1242_v54, %v1220_v47  ;;  %v570_v9 = vld [vmem:[#allocation7 + $0xe68] sm:$0xff] }
 0x150   :  { %1640 = vmatpush.msrb.mxu3 %v486_v6  ;;  %1581 = vmatpush.msrb.mxu0 %v138_v7  ;;  %v672_v6 = vld [vmem:[#allocation7 + $0x1198] sm:$0xff]  ;;  %v330_v7 = vld [vmem:[#allocation7 + $0x6e8] sm:$0xff]  ;;  %v1200_v20 = vadd.f32 %v1199_v51, %v1177_v62 }
 0x151   :  { %1603 = vmatpush.msrb.mxu1 %v240_v8  ;;  %1619 = vmatpush.msrb.mxu2 %v378_v5  ;;  %v432_v8 = vld [vmem:[#allocation7 + $0xa18] sm:$0xff]  ;;  %v630_v54 = vld [vmem:[#allocation7 + $0x1048] sm:$0xff] }
 0x152   :  { %1641 = vmatpush.msrb.mxu3 %v480_v10  ;;  %1543 = vmatmul.f32.gmra.mxu2 %v2170_v31  ;;  %v1222_v10 = vpop.f32.mrf.mxu0  ;;  %v636_v51 = vld [vmem:[#allocation7 + $0x1078] sm:$0xff]  ;;  %v510_v62 = vld [vmem:[#allocation7 + $0xc88] sm:$0xff] }
 0x153   :  { %1582 = vmatpush.msrb.mxu0 %v132_v12  ;;  %1604 = vmatpush.msrb.mxu1 %v234_v13  ;;  %v564_v12 = vld [vmem:[#allocation7 + $0xe38] sm:$0xff] }
 0x154   :  { %1620 = vmatpush.msrb.mxu2 %v372_v14  ;;  %1642 = vmatpush.msrb.mxu3 %v474_v16  ;;  %v324_v13 = vld [vmem:[#allocation7 + $0x6b8] sm:$0xff]  ;;  %v1712_v14 = vperm.slane %v2138_v30, 2  ;;  %v426_v16 = vld [vmem:[#allocation7 + $0x9e8] sm:$0xff] }
 0x155   :  { %1583 = vmatpush.msrb.mxu0 %v126_v22  ;;  %1566 = vmatmul.f32.gmra.mxu3 %v2173_v39  ;;  %v1223_v22 = vadd.f32 %v1222_v10, %v1200_v20  ;;  %v552_v30 = vld [vmem:[#allocation7 + $0xdd8] sm:$0xff] }
 0x156   :  { %1605 = vmatpush.msrb.mxu1 %v228_v21  ;;  %1621 = vmatpush.msrb.mxu2 %v366_v23  ;;  %v558_v21 = vld [vmem:[#allocation7 + $0xe08] sm:$0xff]  ;;  %v660_v23 = vld [vmem:[#allocation7 + $0x1138] sm:$0xff] }
 0x157   :  { %1643 = vmatpush.msrb.mxu3 %v468_v27  ;;  %1584 = vmatpush.msrb.mxu0 %v120_v24  ;;  %v1245_v24 = vpop.f32.mrf.mxu1 }
 0x158   :  { %1606 = vmatpush.msrb.mxu1 %v222_v28  ;;  %1622 = vmatpush.msrb.mxu2 %v360_v38  ;;  %v318_v28 = vld [vmem:[#allocation7 + $0x688] sm:$0xff] }
 0x159   :  { %1644 = vmatpush.msrb.mxu3 %v462_v33  ;;  %1585 = vmatpush.msrb.mxu0 %v114_v34  ;;  %v654_v38 = vld [vmem:[#allocation7 + $0x1108] sm:$0xff]  ;;  %v312_v34 = vld [vmem:[#allocation7 + $0x658] sm:$0xff] }
 0x15a   :  { %1607 = vmatpush.msrb.mxu1 %v216_v36  ;;  %1623 = vmatpush.msrb.mxu2 %v354_v45  ;;  %v1246_v36 = vadd.f32 %v1245_v24, %v1223_v22  ;;  %v546_v45 = vld [vmem:[#allocation7 + $0xda8] sm:$0xff] }
 0x15b   :  { %1645 = vmatpush.msrb.mxu3 %v456_v58  ;;  %1586 = vmatmul.f32.vlgmr.msrb.gmra.mxu0 %v2131_v11  ;;  %v336_v11 = vld [vmem:[#allocation7 + $0x718] sm:$0xff] }
 0x15c   :  { %1608 = vmatpush.msrb.mxu1 %v210_v41  ;;  %1662 = vmatpush.msra.mxu0 %v588_v61  ;;  %v648_v58 = vld [vmem:[#allocation7 + $0x10d8] sm:$0xff]  ;;  %v642_v61 = vld [vmem:[#allocation7 + $0x10a8] sm:$0xff] }
 0x15d   :  { %1624 = vmatpush.msrb.mxu2 %v348_v44  ;;  %1646 = vmatpush.msrb.mxu3 %v450_v46  ;;  %v402_v44 = vld [vmem:[#allocation7 + $0x928] sm:$0xff] }
 0x15e   :  { %1609 = vmatmul.f32.vlgmr.msrb.gmra.mxu1 %v2134_v19  ;;  %1663 = vmatpush.msra.mxu0 %v582_v52  ;;  %v666_v19 = vld [vmem:[#allocation7 + $0x1168] sm:$0xff] }
 0x15f   :  { %1685 = vmatpush.msra.mxu1 %v684_v53  ;;  %1625 = vmatpush.msrb.mxu2 %v342_v57  ;;  %v534_v46 = vld [vmem:[#allocation7 + $0xd48] sm:$0xff]  ;;  %v528_v53 = vld [vmem:[#allocation7 + $0xd18] sm:$0xff] }
 0x160   :  { %1647 = vmatpush.msrb.mxu3 %v444_v59  ;;  %1664 = vmatpush.msra.mxu0 %v576_v60  ;;  %v1265_v5 = vpop.f32.mrf.mxu2  ;;  %v522_v59 = vld [vmem:[#allocation7 + $0xce8] sm:$0xff]  ;;  %v624_v60 = vld [vmem:[#allocation7 + $0x1018] sm:$0xff] }
 0x161   :  { %1686 = vmatpush.msra.mxu1 %v678_v4  ;;  %1626 = vmatpush.msrb.mxu2 %v336_v11  ;;  %v1266_v3 = vadd.f32 %v1265_v5, %v1243_v0  ;;  %v516_v4 = vld [vmem:[#allocation7 + $0xcb8] sm:$0xff]  ;;  %v498_v0 = vld [vmem:[#allocation7 + $0xc28] sm:$0xff] }
 0x162   :  { %1648 = vmatpush.msrb.mxu3 %v438_v63  ;;  %1665 = vmatpush.msra.mxu0 %v570_v9  ;;  %v612_v11 = vld [vmem:[#allocation7 + $0xfb8] sm:$0xff]  ;;  %v606_v63 = vld [vmem:[#allocation7 + $0xf88] sm:$0xff] }
 0x163   :  { %1687 = vmatpush.msra.mxu1 %v672_v6  ;;  %1627 = vmatpush.msrb.mxu2 %v330_v7  ;;  %v1288_v17 = vpop.f32.mrf.mxu3  ;;  %v600_v9 = vld [vmem:[#allocation7 + $0xf58] sm:$0xff]  ;;  %v594_v6 = vld [vmem:[#allocation7 + $0xf28] sm:$0xff] }
 0x164   :  { %1649 = vmatpush.msrb.mxu3 %v432_v8  ;;  %1589 = vmatmul.f32.gmra.mxu0 %v2141_v48  ;;  %v1289_v27 = vadd.f32 %v1288_v17, %v1266_v3  ;;  %v414_v48 = vld [vmem:[#allocation7 + $0x988] sm:$0xff] }
 0x165   :  { %1688 = vmatpush.msra.mxu1 %v666_v19  ;;  %1666 = vmatpush.msra.mxu0 %v564_v12 }
 0x166   :  { %1628 = vmatpush.msrb.mxu2 %v324_v13  ;;  %1650 = vmatpush.msrb.mxu3 %v426_v16  ;;  %v1724_v33 = vadd.f32 %v1712_v14, %v1289_v27 }
 0x167   :  { %1612 = vmatmul.f32.gmra.mxu1 %v2144_v56  ;;  %1667 = vmatpush.msra.mxu0 %v558_v21  ;;  %v540_v56 = vld [vmem:[#allocation7 + $0xd78] sm:$0xff] }
 0x168   :  { %1689 = vmatpush.msra.mxu1 %v660_v23  ;;  %1629 = vmatpush.msrb.mxu2 %v318_v28  ;;  %1736 = vst [vmem:[#allocation11 + $0x10] sm:$0xff] %v1724_v33 }
 0x169   :  { %1651 = vmatpush.msrb.mxu3 %v420_v29  ;;  %1668 = vmatpush.msra.mxu0 %v552_v30  ;;  %v1268_v41 = vpop.f32.mrf.mxu2 }
 0x16a   :  { %1690 = vmatpush.msra.mxu1 %v654_v38  ;;  %1630 = vmatpush.msrb.mxu2 %v312_v34  ;;  %v1269_v43 = vadd.f32 %v1268_v41, %v1246_v36 }
 0x16b   :  { %1652 = vmatpush.msrb.mxu3 %v414_v48  ;;  %1669 = vmatpush.msra.mxu0 %v546_v45 }
 0x16c   :  { %1691 = vmatpush.msra.mxu1 %v648_v58  ;;  %1631 = vmatpush.msrb.mxu2 %v306_v37  ;;  %v1291_v47 = vpop.f32.mrf.mxu3  ;;  %v1311_v7 = vpop.f32.mrf.mxu0 }
 0x16d   :  { %1653 = vmatpush.msrb.mxu3 %v408_v40  ;;  %1632 = vmatmul.f32.vlgmr.msrb.gmra.mxu2 %v2149_v15  ;;  %v1292_v52 = vadd.f32 %v1291_v47, %v1269_v43  ;;  %v618_v15 = vld [vmem:[#allocation7 + $0xfe8] sm:$0xff] }
 0x16e   :  { %1670 = vmatpush.msra.mxu0 %v540_v56  ;;  %1692 = vmatpush.msra.mxu1 %v642_v61 }
 0x16f   :  { %1654 = vmatpush.msrb.mxu3 %v402_v44  ;;  %v1730_v57 = vadd.f32 %v1712_v14, %v1292_v52 }
 0x170   :  { %1655 = vmatmul.f32.vlgmr.msrb.gmra.mxu3 %v2154_v32  ;;  %1671 = vmatpush.msra.mxu0 %v534_v46  ;;  %v504_v32 = vld [vmem:[#allocation7 + $0xc58] sm:$0xff] }
 0x171   :  { %1693 = vmatpush.msra.mxu1 %v636_v51  ;;  %1742 = vst [vmem:[#allocation11 + $0x40] sm:$0xff] %v1730_v57 }
 0x172   :  { %1672 = vmatpush.msra.mxu0 %v528_v53 }
 0x173   :  { %1694 = vmatpush.msra.mxu1 %v630_v54 }
 0x174   :  { %1673 = vmatpush.msra.mxu0 %v522_v59 }
 0x175   :  { %1695 = vmatpush.msra.mxu1 %v624_v60  ;;  %1635 = vmatmul.f32.gmra.mxu2 %v2157_v50  ;;  %v1334_v50 = vpop.f32.mrf.mxu1  ;;  %v1314_v5 = vpop.f32.mrf.mxu0 }
 0x176   :  { %1674 = vmatpush.msra.mxu0 %v516_v4  ;;  %v1315_v12 = vadd.f32 %v1314_v5, %v2118_v25 }
 0x177   :  { %1696 = vmatpush.msra.mxu1 %v618_v15 }
 0x178   :  { %1658 = vmatmul.f32.gmra.mxu3 %v2160_v55  ;;  %1675 = vmatpush.msra.mxu0 %v510_v62  ;;  %v1312_v55 = vadd.f32 %v1311_v7, %v2108_v2 }
 0x179   :  { %1697 = vmatpush.msra.mxu1 %v612_v11 }
 0x17a   :  { %1676 = vmatpush.msra.mxu0 %v504_v32  ;;  %v1335_v19 = vadd.f32 %v1334_v50, %v1312_v55 }
 0x17b   :  { %1698 = vmatpush.msra.mxu1 %v606_v63 }
 0x17c   :  { %1677 = vmatpush.msra.mxu0 %v498_v0 }
 0x17d   :  { %1699 = vmatpush.msra.mxu1 %v600_v9  ;;  %1678 = vmatmul.f32.vlgmr.msra.gmra.mxu0 %v2163_v1  ;;  %v1337_v10 = vpop.f32.mrf.mxu1 }
 0x17e   :  { %v1338_v17 = vadd.f32 %v1337_v10, %v1315_v12 }
 0x17f   :  { %1700 = vmatpush.msra.mxu1 %v594_v6 }
 0x180   :  { %1701 = vmatmul.f32.vlgmr.msra.gmra.mxu1 %v2166_v35  ;;  %v2211_v35 = vld [vmem:[#allocation10] sm:$0x3f] }
 0x181   :  { %v1714_v47 = vperm.slane %v2211_v35, 4 }
 0x184   :  { %v1357_v8 = vpop.f32.mrf.mxu2 }
 0x185   :  { %1681 = vmatmul.f32.gmra.mxu0 %v2170_v31  ;;  %v1358_v3 = vadd.f32 %v1357_v8, %v1335_v19  ;;  %v1713_v31 = vperm.slane %v2211_v35, 3 }
 0x187   :  { %v1380_v20 = vpop.f32.mrf.mxu3 }
 0x188   :  { %1704 = vmatmul.f32.gmra.mxu1 %v2173_v39  ;;  %v1381_v1 = vadd.f32 %v1380_v20, %v1358_v3  ;;  %v1715_v20 = vperm.slane %v2211_v35, 5 }
 0x18d   :  { %v1360_v14 = vpop.f32.mrf.mxu2 }
 0x18e   :  { %v1361_v39 = vadd.f32 %v1360_v14, %v1338_v17 }
 0x190   :  { %v1403_v13 = vpop.f32.mrf.mxu0  ;;  %v1383_v21 = vpop.f32.mrf.mxu3 }
 0x191   :  { %v1404_v16 = vadd.f32 %v1403_v13, %v1381_v1  ;;  %v1384_v27 = vadd.f32 %v1383_v21, %v1361_v39 }
 0x193   :  { %v1426_v2 = vpop.f32.mrf.mxu1 }
 0x194   :  { %v1427_v22 = vadd.f32 %v1426_v2, %v1404_v16 }
 0x196   :  { %v1725_v23 = vadd.f32 %v1713_v31, %v1427_v22 }
 0x198   :  { %1737 = vst [vmem:[#allocation11 + $0x18] sm:$0xff] %v1725_v23 }
 0x199   :  { %v1406_v24 = vpop.f32.mrf.mxu0 }
 0x19a   :  { %v1407_v28 = vadd.f32 %v1406_v24, %v1384_v27 }
 0x19c   :  { %v1429_v29 = vpop.f32.mrf.mxu1 }
 0x19d   :  { %v1430_v25 = vadd.f32 %v1429_v29, %v1407_v28 }
 0x19f   :  { %v1731_v30 = vadd.f32 %v1713_v31, %v1430_v25 }
 0x1a1   :  { %1743 = vst [vmem:[#allocation11 + $0x48] sm:$0xff] %v1731_v30 }
 0x1a8   :  { %v1449_v38 = vpop.f32.mrf.mxu2 }
 0x1a9   :  { %v1450_v34 = vadd.f32 %v1449_v38, %v2114_v18 }
 0x1ab   :  { %v1472_v33 = vpop.f32.mrf.mxu3 }
 0x1ac   :  { %v1473_v45 = vadd.f32 %v1472_v33, %v1450_v34 }
 0x1b1   :  { %v1452_v36 = vpop.f32.mrf.mxu2 }
 0x1b2   :  { %v1453_v41 = vadd.f32 %v1452_v36, %v2124_v42 }
 0x1b4   :  { %v1495_v48 = vpop.f32.mrf.mxu0  ;;  %v1475_v37 = vpop.f32.mrf.mxu3 }
 0x1b5   :  { %v1496_v58 = vadd.f32 %v1495_v48, %v1473_v45  ;;  %v1476_v46 = vadd.f32 %v1475_v37, %v1453_v41 }
 0x1b7   :  { %v1518_v40 = vpop.f32.mrf.mxu1 }
 0x1b8   :  { %v1519_v56 = vadd.f32 %v1518_v40, %v1496_v58 }
 0x1bd   :  { %v1498_v61 = vpop.f32.mrf.mxu0 }
 0x1be   :  { %v1499_v52 = vadd.f32 %v1498_v61, %v1476_v46 }
 0x1c0   :  { %v1521_v54 = vpop.f32.mrf.mxu1 }
 0x1c1   :  { %v1522_v57 = vadd.f32 %v1521_v54, %v1499_v52 }
 0x1cc   :  { %v1541_v43 = vpop.f32.mrf.mxu2 }
 0x1cd   :  { %v1542_v44 = vadd.f32 %v1541_v43, %v1519_v56 }
 0x1cf   :  { %v1564_v51 = vpop.f32.mrf.mxu3 }
 0x1d0   :  { %v1565_v53 = vadd.f32 %v1564_v51, %v1542_v44 }
 0x1d2   :  { %v1726_v18 = vadd.f32 %v1714_v47, %v1565_v53 }
 0x1d4   :  { %1738 = vst [vmem:[#allocation11 + $0x20] sm:$0xff] %v1726_v18 }
 0x1d5   :  { %v1544_v59 = vpop.f32.mrf.mxu2 }
 0x1d6   :  { %v1545_v60 = vadd.f32 %v1544_v59, %v1522_v57 }
 0x1d8   :  { %v1567_v4 = vpop.f32.mrf.mxu3  ;;  %v1587_v42 = vpop.f32.mrf.mxu0 }
 0x1d9   :  { %v1568_v15 = vadd.f32 %v1567_v4, %v1545_v60  ;;  %v1588_v32 = vadd.f32 %v1587_v42, %v2120_v26 }
 0x1db   :  { %v1732_v62 = vadd.f32 %v1714_v47, %v1568_v15  ;;  %v1610_v11 = vpop.f32.mrf.mxu1 }
 0x1dc   :  { %v1611_v9 = vadd.f32 %v1610_v11, %v1588_v32 }
 0x1dd   :  { %1744 = vst [vmem:[#allocation11 + $0x50] sm:$0xff] %v1732_v62 }
 0x1e1   :  { %v1590_v0 = vpop.f32.mrf.mxu0 }
 0x1e2   :  { %v1591_v55 = vadd.f32 %v1590_v0, %v2126_v49 }
 0x1e4   :  { %v1613_v7 = vpop.f32.mrf.mxu1 }
 0x1e5   :  { %v1614_v10 = vadd.f32 %v1613_v7, %v1591_v55 }
 0x1f0   :  { %v1633_v63 = vpop.f32.mrf.mxu2 }
 0x1f1   :  { %v1634_v50 = vadd.f32 %v1633_v63, %v1611_v9 }
 0x1f3   :  { %v1656_v6 = vpop.f32.mrf.mxu3 }
 0x1f4   :  { %v1657_v8 = vadd.f32 %v1656_v6, %v1634_v50 }
 0x1f8   :  { %v1636_v5 = vpop.f32.mrf.mxu2 }
 0x1f9   :  { %v1637_v12 = vadd.f32 %v1636_v5, %v1614_v10 }
 0x1fa   :  { %v1679_v19 = vpop.f32.mrf.mxu0 }
 0x1fb   :  { %v1680_v3 = vadd.f32 %v1679_v19, %v1657_v8  ;;  %v1659_v13 = vpop.f32.mrf.mxu3 }
 0x1fc   :  { %v1660_v16 = vadd.f32 %v1659_v13, %v1637_v12 }
 0x1fd   :  { %v1702_v1 = vpop.f32.mrf.mxu1 }
 0x1fe   :  { %v1703_v14 = vadd.f32 %v1702_v1, %v1680_v3 }
 0x200   :  { %v1727_v26 = vadd.f32 %v1715_v20, %v1703_v14 }
 0x202   :  { %1739 = vst [vmem:[#allocation11 + $0x28] sm:$0xff] %v1727_v26  ;;  %v1682_v31 = vpop.f32.mrf.mxu0 }
 0x203   :  { %v1683_v17 = vadd.f32 %v1682_v31, %v1660_v16 }
 0x205   :  { %v1705_v2 = vpop.f32.mrf.mxu1 }
 0x206   :  { %v1706_v49 = vadd.f32 %v1705_v2, %v1683_v17 }
 0x208   :  { %v1733_v22 = vadd.f32 %v1715_v20, %v1706_v49 }
 0x20a   :  { %1745 = vst [vmem:[#allocation11 + $0x58] sm:$0xff] %v1733_v22 }
 0x20b   :  { %1758 = dma.vmem_to_hbm [thread:$0]  %s1751_s18, 1536, %s1753_s21, [#allocation4], %s1958_s1, %s1958_s1, %s1959_s8  }
 0x20c   :  { %1952 = dma.done.wait [#allocation4], 1536  }
 0x20d   :  { %1953 = vsyncadd [#allocation4], 4294965760 }
 0x20e   :  { %1763 = vsyncpa [#allocation3], 1 }
 0x20f   :  { %1764 = vsyncpa [#allocation6], 1 }
 0x210   :  { %1765 = vsyncpa [#allocation9], 1 }
 0x211   :  { %1766 = vsyncpa [#allocation4], 1 }

</bundles_post_ra>
